<compile_context>
chip_gen: v7x
topology: tpu7x:2x2x1
jax: 0.10.0
libtpu: 0.0.40
codegen_flags: <defaults>
</compile_context>

<pallas_src>
import functools

import jax
import jax.numpy as jnp
from jax.experimental import pallas as pl
from jax.experimental.pallas import tpu as pltpu

EPS = 1e-6


# --------------------------- AdaLIN scale/shift ------------------------------
def _ada_scale_shift(y, mask, bias, gamma, beta, rho, n, c):
    """Fold AdaLIN(conv_out + bias) into a per-channel (scale, shift).

    y:     (C, P) conv output WITHOUT bias (f32).
    mask:  (1, P) 1.0 at valid spatial columns, 0.0 at wrap columns.
    bias:  (C, 1) conv bias; gamma/beta: (C, 1); rho: scalar; n = H*W.
    Returns (scale, shift) such that AdaLIN(y + bias) == y * scale + shift.
    """
    ym = y * mask
    s = jnp.sum(ym, axis=1, keepdims=True)                  # (C, 1)
    q = jnp.sum(ym * ym, axis=1, keepdims=True)             # (C, 1)
    mean_y = s * (1.0 / n)
    ssq = jnp.maximum(q - n * mean_y * mean_y, 0.0)         # Σ (y - mean)^2 per channel
    ins_mean = mean_y + bias                                # conv bias folded analytically
    inv_ins = jax.lax.rsqrt(ssq * (1.0 / (n - 1.0)) + EPS)
    ln_mean = jnp.mean(ins_mean)                            # equal counts per channel
    ssq_ln = jnp.sum(ssq) + n * jnp.sum((ins_mean - ln_mean) ** 2)
    inv_ln = jax.lax.rsqrt(ssq_ln * (1.0 / (c * n - 1.0)) + EPS)
    scale = gamma * (rho * inv_ins + (1.0 - rho) * inv_ln)
    shift = (beta
             - gamma * (rho * ins_mean * inv_ins + (1.0 - rho) * ln_mean * inv_ln)
             + bias * scale)
    return scale, shift


# ----------------------------- fused Pallas kernel ---------------------------
def _resblock_kernel(xf_ref, col_ref, w1_ref, b1_ref, w2_ref, b2_ref,
                     gamma_ref, beta_ref, rho_ref, out_ref, x1p_ref,
                     *, height, width, anime):
    """conv1 -> AdaLIN1 -> relu -> conv2 -> AdaLIN2 for one batch element.

    xf_ref:    (1, C, P2+2)  reflection-padded input, flattened, 1 zero lead + 1 tail
    col_ref:   (1, P)  int32 column index (j % (W+2)) over the output lane layout
    w1/w2_ref: (C, 9*C) conv weights, columns (ky, kx, ci)-major
    b1/b2_ref: (C, 1) conv biases (f32)
    gamma/beta_ref: (1, C, 1) AdaLIN affine for this batch element (f32)
    rho_ref:   (1, 2) SMEM  [rho1, rho2]
    out_ref:   (1, C, P)  P = H*(W+2); wrap columns hold garbage (sliced in wrapper)
    x1p_ref:   (C, P2+2) VMEM scratch holding the reflection-padded stage-1 output
    """
    c = w1_ref.shape[0]
    wp = width + 2
    p = height * wp
    p2 = (height + 2) * wp
    n = float(height * width)

    col = col_ref[...]                                   # (1, P) int32
    gamma = gamma_ref[0]                                 # (C, 1)
    beta = beta_ref[0]
    rho1 = rho_ref[0, 0]
    rho2 = rho_ref[0, 1]
    if not anime:
        rho1 = jnp.clip(rho1 - 0.1, 0.0, 1.0)
        rho2 = jnp.clip(rho2 - 0.1, 0.0, 1.0)

    # ---- stage 1: conv1 as 9 accumulating MXU matmuls (K = C per tap) ----
    # Stage-1 output uses a +1 column phase (valid columns at col in [1, W]) so that
    # the padded-x1 interior store below lands on a clean row phase.
    y1 = None
    for t in range(9):
        ky, kx = divmod(t, 3)
        off = ky * wp + kx
        part = jnp.dot(w1_ref[:, pl.ds(t * c, c)],
                       xf_ref[0, :, pl.ds(off, p)],
                       preferred_element_type=jnp.float32)
        y1 = part if y1 is None else y1 + part

    mask1 = jnp.logical_and(col >= 1, col <= width).astype(jnp.float32)
    scale1, shift1 = _ada_scale_shift(y1, mask1, b1_ref[...], gamma, beta, rho1, n, c)
    x1 = jnp.maximum(y1 * scale1 + shift1, 0.0).astype(x1p_ref.dtype)   # (C, P)

    # ---- rebuild reflection-padded x1 in VMEM (rows 0..H+1, width W+2) ----
    x1p_ref[:, pl.ds(wp, p)] = x1                        # interior rows 1..H (pads garbage)
    v_p2 = x1p_ref[:, pl.ds(wp + 2, p)]                  # x1[j + 2] -> left-reflect source
    v_m2 = x1p_ref[:, pl.ds(wp - 2, p)]                  # x1[j - 2] -> right-reflect source
    fixed = jnp.where(col == 0, v_p2, jnp.where(col == wp - 1, v_m2, x1))
    x1p_ref[:, pl.ds(wp, p)] = fixed
    # top / bottom reflected rows (copy already width-fixed rows), then zero the 2 tail
    # columns read by the (ky=2, kx>=1) taps so garbage can never be NaN.
    x1p_ref[:, pl.ds(0, wp)] = x1p_ref[:, pl.ds(2 * wp, wp)]
    x1p_ref[:, pl.ds((height + 1) * wp, wp)] = x1p_ref[:, pl.ds((height - 1) * wp, wp)]
    x1p_ref[:, pl.ds(p2, 2)] = jnp.zeros((c, 2), x1p_ref.dtype)

    # ---- stage 2: conv2 + AdaLIN2 (output at phase 0: valid columns [0, W)) ----
    y2 = None
    for t in range(9):
        ky, kx = divmod(t, 3)
        off = ky * wp + kx
        part = jnp.dot(w2_ref[:, pl.ds(t * c, c)],
                       x1p_ref[:, pl.ds(off, p)],
                       preferred_element_type=jnp.float32)
        y2 = part if y2 is None else y2 + part

    mask2 = (col < width).astype(jnp.float32)
    scale2, shift2 = _ada_scale_shift(y2, mask2, b2_ref[...], gamma, beta, rho2, n, c)
    out_ref[0] = (y2 * scale2 + shift2).astype(out_ref.dtype)


# --------------------------------- JAX glue -----------------------------------
def _vmem_limit_bytes(c, p, p2, itemsize):
    """Per-step footprint (double-buffered I/O + scratch + live f32 temps) with headroom,
    capped at 3/4 of physical per-core VMEM (v7x has only 64 MiB)."""
    per_step = (2 * c * (p2 + 2) * itemsize       # padded input
                + 2 * p * 4                        # col
                + 2 * 2 * c * 9 * c * itemsize     # two weight matrices
                + 4 * c * 4                        # biases, gamma, beta
                + 2 * c * p * 4                    # output
                + c * (p2 + 2) * itemsize          # x1p scratch
                + 6 * c * p * 4)                   # live f32 working tiles
    try:
        cap = int(pltpu.get_tpu_info().vmem_capacity_bytes)
    except Exception:
        cap = 64 * 1024 * 1024
    return int(min(max(2 * per_step, 32 * 1024 * 1024), (cap * 3) // 4))


def res_block_ada_lin(x, gamma, beta, params, anime=False,
                      compute_dtype=jnp.bfloat16):
    """ResBlockByAdaLIN forward: x + AdaLIN2(conv2(relu(AdaLIN1(conv1(x))))).

    Matmuls run in `compute_dtype` (bf16 fast path by default, f32 for bit-accuracy);
    all statistics, the epilogues and the residual add stay in f32.
    """
    b, c, h, w = x.shape
    assert params["w1"].shape[0] == c and params["w2"].shape[0] == c, \
        "ResBlockByAdaLIN requires out_dim == dim"
    wp = w + 2
    p = h * wp
    p2 = (h + 2) * wp
    xdt = jnp.dtype(compute_dtype)

    # reflection-pad x, flatten spatial dims; 1 leading zero column (stage-1 output is
    # computed at a +1 column phase) and 1 trailing so the last tap slice stays in-bounds.
    xp = jnp.pad(x.astype(jnp.float32), ((0, 0), (0, 0), (1, 1), (1, 1)), mode="reflect")
    xf = jnp.pad(xp.reshape(b, c, p2), ((0, 0), (0, 0), (1, 1))).astype(xdt)

    # conv weights as (C, 9*C) matrices, columns ordered (ky, kx, ci)-major
    w1m = jnp.transpose(params["w1"], (0, 2, 3, 1)).reshape(c, 9 * c).astype(xdt)
    w2m = jnp.transpose(params["w2"], (0, 2, 3, 1)).reshape(c, 9 * c).astype(xdt)
    b1c = params["b1"].reshape(c, 1).astype(jnp.float32)
    b2c = params["b2"].reshape(c, 1).astype(jnp.float32)
    g = gamma.reshape(b, c, 1).astype(jnp.float32)
    bt = beta.reshape(b, c, 1).astype(jnp.float32)
    rho = jnp.stack([params["rho1"].reshape(()),
                     params["rho2"].reshape(())]).reshape(1, 2).astype(jnp.float32)
    col = (jnp.arange(p, dtype=jnp.int32) % wp).reshape(1, p)

    kernel = functools.partial(_resblock_kernel, height=h, width=w, anime=anime)

    in_specs = [
        pl.BlockSpec((1, c, p2 + 2), lambda i: (i, 0, 0)),    # padded-flat conv input
        pl.BlockSpec((1, p), lambda i: (0, 0)),               # lane column index
        pl.BlockSpec((c, 9 * c), lambda i: (0, 0)),           # conv1 weights
        pl.BlockSpec((c, 1), lambda i: (0, 0)),               # conv1 bias
        pl.BlockSpec((c, 9 * c), lambda i: (0, 0)),           # conv2 weights
        pl.BlockSpec((c, 1), lambda i: (0, 0)),               # conv2 bias
        pl.BlockSpec((1, c, 1), lambda i: (i, 0, 0)),         # gamma
        pl.BlockSpec((1, c, 1), lambda i: (i, 0, 0)),         # beta
        pl.BlockSpec(memory_space=pltpu.MemorySpace.SMEM),    # [rho1, rho2]
    ]

    out_padded = pl.pallas_call(
        kernel,
        out_shape=jax.ShapeDtypeStruct((b, c, p), jnp.float32),
        grid=(b,),
        in_specs=in_specs,
        out_specs=pl.BlockSpec((1, c, p), lambda i: (i, 0, 0)),
        scratch_shapes=[pltpu.VMEM((c, p2 + 2), xdt)],
        compiler_params=pltpu.CompilerParams(
            dimension_semantics=("parallel",),
            vmem_limit_bytes=_vmem_limit_bytes(c, p, p2, xdt.itemsize)),
    )(xf, col, w1m, b1c, w2m, b2c, g, bt, rho)

    # single slice at the very end (drops wrap columns), fused with the residual add by XLA
    x2 = out_padded.reshape(b, c, h, wp)[:, :, :, :w]
    return x + x2


# ------------------------------ pure-JAX reference ----------------------------
def _conv3x3_reflect_ref(x, w, bias):
    xp = jnp.pad(x, ((0, 0), (0, 0), (1, 1), (1, 1)), mode="reflect")
    y = jax.lax.conv_general_dilated(xp, w, window_strides=(1, 1), padding="VALID",
                                     dimension_numbers=("NCHW", "OIHW", "NCHW"))
    return y + bias.reshape(1, -1, 1, 1)


def _ada_lin_ref(x, gamma, beta, rho, anime):
    b, c, h, w = x.shape
    xr = x.reshape(b, c, -1)
    ins_mean = xr.mean(axis=2).reshape(b, c, 1, 1)
    ins_std = jnp.sqrt(xr.var(axis=2, ddof=1) + EPS).reshape(b, c, 1, 1)
    x_ins = (x - ins_mean) / ins_std
    xf = x.reshape(b, -1)
    ln_mean = xf.mean(axis=1).reshape(b, 1, 1, 1)
    ln_std = jnp.sqrt(xf.var(axis=1, ddof=1).reshape(b, 1, 1, 1) + EPS)
    x_ln = (x - ln_mean) / ln_std
    r = rho[0, 0] if anime else jnp.clip(rho[0, 0] - 0.1, 0.0, 1.0)
    return (r * x_ins + (1.0 - r) * x_ln) * gamma + beta


def res_block_ref(x, gamma, beta, w1, b1, w2, b2, rho, anime=False):
    x1 = _conv3x3_reflect_ref(x, w1, b1)
    x1 = jax.nn.relu(_ada_lin_ref(x1, gamma, beta, rho, anime))
    x2 = _conv3x3_reflect_ref(x1, w2, b2)
    x2 = _ada_lin_ref(x2, gamma, beta, rho, anime)
    return x + x2


# ------------------------------------ main -------------------------------------
if __name__ == "__main__":
    key = jax.random.PRNGKey(0)
    b, dim, h, w = 2, 4, 16, 16

    ks = jax.random.split(key, 7)
    x = jax.random.normal(ks[0], (b, dim, h, w), jnp.float32)
    gamma = jax.random.normal(ks[1], (b, dim, 1, 1), jnp.float32)
    beta = jax.random.normal(ks[2], (b, dim, 1, 1), jnp.float32)
    w1 = jax.random.normal(ks[3], (dim, dim, 3, 3), jnp.float32) * 0.1
    b1 = jax.random.normal(ks[4], (dim,), jnp.float32) * 0.05
    w2 = jax.random.normal(ks[5], (dim, dim, 3, 3), jnp.float32) * 0.1
    b2 = jax.random.normal(ks[6], (dim,), jnp.float32) * 0.05
    rho = jnp.full((1, 1), 0.9, jnp.float32)  # nn.Parameter(torch.FloatTensor(1).fill_(0.9))

    params = dict(w1=w1, b1=b1, w2=w2, b2=b2, rho1=rho, rho2=rho)
    ref = res_block_ref(x, gamma, beta, w1, b1, w2, b2, rho, anime=False)

    # exact-precision path (f32 matmuls) — must match the f32 reference tightly
    out = jax.block_until_ready(
        res_block_ada_lin(x, gamma, beta, params, anime=False,
                          compute_dtype=jnp.float32))
    assert out.shape == (b, dim, h, w), out.shape
    max_err = float(jnp.max(jnp.abs(out - ref)))
    assert jnp.allclose(out, ref, atol=1e-4, rtol=1e-4), f"f32 max_err={max_err}"

    # fast path (bf16 matmuls, f32 stats/accumulation) — loose sanity check
    out_bf16 = jax.block_until_ready(
        res_block_ada_lin(x, gamma, beta, params, anime=False,
                          compute_dtype=jnp.bfloat16))
    max_err_bf16 = float(jnp.max(jnp.abs(out_bf16 - ref)))
    assert jnp.isfinite(max_err_bf16) and max_err_bf16 < 0.5, f"bf16 max_err={max_err_bf16}"

    print("KERNEL_OK")
</pallas_src>

<mosaic_0001>
module attributes {stable_mosaic.version = 11 : i64} {
  func.func @_resblock_kernel(%arg0: i32, %arg1: memref<1x4x326xf32, #tpu.memory_space<vmem>>, %arg2: memref<1x288xi32, #tpu.memory_space<vmem>>, %arg3: memref<4x36xf32, #tpu.memory_space<vmem>>, %arg4: memref<4x1xf32, #tpu.memory_space<vmem>>, %arg5: memref<4x36xf32, #tpu.memory_space<vmem>>, %arg6: memref<4x1xf32, #tpu.memory_space<vmem>>, %arg7: memref<1x4x1xf32, #tpu.memory_space<vmem>>, %arg8: memref<1x4x1xf32, #tpu.memory_space<vmem>>, %arg9: memref<1x2xf32, #tpu.memory_space<smem>>, %arg10: memref<1x4x288xf32, #tpu.memory_space<vmem>>, %arg11: memref<4x326xf32, #tpu.memory_space<vmem>>) attributes {dimension_semantics = [#tpu.dimension_semantics<parallel>], iteration_bounds = array<i64: 2>, scalar_prefetch = 0 : i64, scratch_operands = 1 : i64, tpu.core_type = #tpu.core_type<tc>, window_params = [{transform_indices = @transform_0, window_bounds = array<i64: 1, 4, 326>}, {pipeline_mode = #tpu.pipeline_mode<synchronous>, transform_indices = @transform_1, window_bounds = array<i64: 1, 288>}, {pipeline_mode = #tpu.pipeline_mode<synchronous>, transform_indices = @transform_2, window_bounds = array<i64: 4, 36>}, {pipeline_mode = #tpu.pipeline_mode<synchronous>, transform_indices = @transform_3, window_bounds = array<i64: 4, 1>}, {pipeline_mode = #tpu.pipeline_mode<synchronous>, transform_indices = @transform_4, window_bounds = array<i64: 4, 36>}, {pipeline_mode = #tpu.pipeline_mode<synchronous>, transform_indices = @transform_5, window_bounds = array<i64: 4, 1>}, {transform_indices = @transform_6, window_bounds = array<i64: 1, 4, 1>}, {transform_indices = @transform_7, window_bounds = array<i64: 1, 4, 1>}, {transform_indices = @transform_8, window_bounds = array<i64: 1, 2>}, {transform_indices = @transform_9, window_bounds = array<i64: 1, 4, 288>}]} {
    %c0 = arith.constant 0 : index
    %c0_0 = arith.constant 0 : index
    %0 = vector.load %arg2[%c0, %c0_0] : memref<1x288xi32, #tpu.memory_space<vmem>>, vector<1x288xi32>
    %c0_1 = arith.constant 0 : index
    %c0_2 = arith.constant 0 : index
    %c0_3 = arith.constant 0 : index
    %1 = vector.load %arg7[%c0_1, %c0_2, %c0_3] : memref<1x4x1xf32, #tpu.memory_space<vmem>>, vector<1x4x1xf32>
    %2 = vector.shape_cast %1 : vector<1x4x1xf32> to vector<4x1xf32>
    %c0_4 = arith.constant 0 : index
    %c0_5 = arith.constant 0 : index
    %c0_6 = arith.constant 0 : index
    %3 = vector.load %arg8[%c0_4, %c0_5, %c0_6] : memref<1x4x1xf32, #tpu.memory_space<vmem>>, vector<1x4x1xf32>
    %4 = vector.shape_cast %3 : vector<1x4x1xf32> to vector<4x1xf32>
    %c0_7 = arith.constant 0 : index
    %c0_8 = arith.constant 0 : index
    %5 = memref.load %arg9[%c0_7, %c0_8] : memref<1x2xf32, #tpu.memory_space<smem>>
    %c0_9 = arith.constant 0 : index
    %c1 = arith.constant 1 : index
    %6 = memref.load %arg9[%c0_9, %c1] : memref<1x2xf32, #tpu.memory_space<smem>>
    %cst = arith.constant 1.000000e-01 : f32
    %7 = arith.subf %5, %cst : f32
    %cst_10 = arith.constant 0.000000e+00 : f32
    %cst_11 = arith.constant 1.000000e+00 : f32
    %8 = arith.maximumf %cst_10, %7 : f32
    %9 = arith.minimumf %cst_11, %8 : f32
    %cst_12 = arith.constant 1.000000e-01 : f32
    %10 = arith.subf %6, %cst_12 : f32
    %cst_13 = arith.constant 0.000000e+00 : f32
    %cst_14 = arith.constant 1.000000e+00 : f32
    %11 = arith.maximumf %cst_13, %10 : f32
    %12 = arith.minimumf %cst_14, %11 : f32
    %c0_15 = arith.constant 0 : index
    %c0_16 = arith.constant 0 : index
    %13 = vector.load %arg3[%c0_15, %c0_16] : memref<4x36xf32, #tpu.memory_space<vmem>>, vector<4x4xf32>
    %c0_17 = arith.constant 0 : index
    %c0_18 = arith.constant 0 : index
    %c0_19 = arith.constant 0 : index
    %14 = vector.load %arg1[%c0_17, %c0_18, %c0_19] : memref<1x4x326xf32, #tpu.memory_space<vmem>>, vector<1x4x288xf32>
    %15 = vector.shape_cast %14 : vector<1x4x288xf32> to vector<4x288xf32>
    %cst_20 = arith.constant dense<0.000000e+00> : vector<4x288xf32>
    %16 = tpu.matmul %13, %15, %cst_20 {dimension_numbers = #tpu.dot_dimension_numbers<[1], [0], [0], [1], [0, 0, 1, 1], [], []>} : vector<4x4xf32>, vector<4x288xf32>, vector<4x288xf32> -> vector<4x288xf32>
    %c0_21 = arith.constant 0 : index
    %c4 = arith.constant 4 : index
    %17 = vector.load %arg3[%c0_21, %c4] : memref<4x36xf32, #tpu.memory_space<vmem>>, vector<4x4xf32>
    %c0_22 = arith.constant 0 : index
    %c0_23 = arith.constant 0 : index
    %c1_24 = arith.constant 1 : index
    %18 = vector.load %arg1[%c0_22, %c0_23, %c1_24] : memref<1x4x326xf32, #tpu.memory_space<vmem>>, vector<1x4x288xf32>
    %19 = vector.shape_cast %18 : vector<1x4x288xf32> to vector<4x288xf32>
    %cst_25 = arith.constant dense<0.000000e+00> : vector<4x288xf32>
    %20 = tpu.matmul %17, %19, %cst_25 {dimension_numbers = #tpu.dot_dimension_numbers<[1], [0], [0], [1], [0, 0, 1, 1], [], []>} : vector<4x4xf32>, vector<4x288xf32>, vector<4x288xf32> -> vector<4x288xf32>
    %21 = arith.addf %16, %20 : vector<4x288xf32>
    %c0_26 = arith.constant 0 : index
    %c8 = arith.constant 8 : index
    %22 = vector.load %arg3[%c0_26, %c8] : memref<4x36xf32, #tpu.memory_space<vmem>>, vector<4x4xf32>
    %c0_27 = arith.constant 0 : index
    %c0_28 = arith.constant 0 : index
    %c2 = arith.constant 2 : index
    %23 = vector.load %arg1[%c0_27, %c0_28, %c2] : memref<1x4x326xf32, #tpu.memory_space<vmem>>, vector<1x4x288xf32>
    %24 = vector.shape_cast %23 : vector<1x4x288xf32> to vector<4x288xf32>
    %cst_29 = arith.constant dense<0.000000e+00> : vector<4x288xf32>
    %25 = tpu.matmul %22, %24, %cst_29 {dimension_numbers = #tpu.dot_dimension_numbers<[1], [0], [0], [1], [0, 0, 1, 1], [], []>} : vector<4x4xf32>, vector<4x288xf32>, vector<4x288xf32> -> vector<4x288xf32>
    %26 = arith.addf %21, %25 : vector<4x288xf32>
    %c0_30 = arith.constant 0 : index
    %c12 = arith.constant 12 : index
    %27 = vector.load %arg3[%c0_30, %c12] : memref<4x36xf32, #tpu.memory_space<vmem>>, vector<4x4xf32>
    %c0_31 = arith.constant 0 : index
    %c0_32 = arith.constant 0 : index
    %c18 = arith.constant 18 : index
    %28 = vector.load %arg1[%c0_31, %c0_32, %c18] : memref<1x4x326xf32, #tpu.memory_space<vmem>>, vector<1x4x288xf32>
    %29 = vector.shape_cast %28 : vector<1x4x288xf32> to vector<4x288xf32>
    %cst_33 = arith.constant dense<0.000000e+00> : vector<4x288xf32>
    %30 = tpu.matmul %27, %29, %cst_33 {dimension_numbers = #tpu.dot_dimension_numbers<[1], [0], [0], [1], [0, 0, 1, 1], [], []>} : vector<4x4xf32>, vector<4x288xf32>, vector<4x288xf32> -> vector<4x288xf32>
    %31 = arith.addf %26, %30 : vector<4x288xf32>
    %c0_34 = arith.constant 0 : index
    %c16 = arith.constant 16 : index
    %32 = vector.load %arg3[%c0_34, %c16] : memref<4x36xf32, #tpu.memory_space<vmem>>, vector<4x4xf32>
    %c0_35 = arith.constant 0 : index
    %c0_36 = arith.constant 0 : index
    %c19 = arith.constant 19 : index
    %33 = vector.load %arg1[%c0_35, %c0_36, %c19] : memref<1x4x326xf32, #tpu.memory_space<vmem>>, vector<1x4x288xf32>
    %34 = vector.shape_cast %33 : vector<1x4x288xf32> to vector<4x288xf32>
    %cst_37 = arith.constant dense<0.000000e+00> : vector<4x288xf32>
    %35 = tpu.matmul %32, %34, %cst_37 {dimension_numbers = #tpu.dot_dimension_numbers<[1], [0], [0], [1], [0, 0, 1, 1], [], []>} : vector<4x4xf32>, vector<4x288xf32>, vector<4x288xf32> -> vector<4x288xf32>
    %36 = arith.addf %31, %35 : vector<4x288xf32>
    %c0_38 = arith.constant 0 : index
    %c20 = arith.constant 20 : index
    %37 = vector.load %arg3[%c0_38, %c20] : memref<4x36xf32, #tpu.memory_space<vmem>>, vector<4x4xf32>
    %c0_39 = arith.constant 0 : index
    %c0_40 = arith.constant 0 : index
    %c20_41 = arith.constant 20 : index
    %38 = vector.load %arg1[%c0_39, %c0_40, %c20_41] : memref<1x4x326xf32, #tpu.memory_space<vmem>>, vector<1x4x288xf32>
    %39 = vector.shape_cast %38 : vector<1x4x288xf32> to vector<4x288xf32>
    %cst_42 = arith.constant dense<0.000000e+00> : vector<4x288xf32>
    %40 = tpu.matmul %37, %39, %cst_42 {dimension_numbers = #tpu.dot_dimension_numbers<[1], [0], [0], [1], [0, 0, 1, 1], [], []>} : vector<4x4xf32>, vector<4x288xf32>, vector<4x288xf32> -> vector<4x288xf32>
    %41 = arith.addf %36, %40 : vector<4x288xf32>
    %c0_43 = arith.constant 0 : index
    %c24 = arith.constant 24 : index
    %42 = vector.load %arg3[%c0_43, %c24] : memref<4x36xf32, #tpu.memory_space<vmem>>, vector<4x4xf32>
    %c0_44 = arith.constant 0 : index
    %c0_45 = arith.constant 0 : index
    %c36 = arith.constant 36 : index
    %43 = vector.load %arg1[%c0_44, %c0_45, %c36] : memref<1x4x326xf32, #tpu.memory_space<vmem>>, vector<1x4x288xf32>
    %44 = vector.shape_cast %43 : vector<1x4x288xf32> to vector<4x288xf32>
    %cst_46 = arith.constant dense<0.000000e+00> : vector<4x288xf32>
    %45 = tpu.matmul %42, %44, %cst_46 {dimension_numbers = #tpu.dot_dimension_numbers<[1], [0], [0], [1], [0, 0, 1, 1], [], []>} : vector<4x4xf32>, vector<4x288xf32>, vector<4x288xf32> -> vector<4x288xf32>
    %46 = arith.addf %41, %45 : vector<4x288xf32>
    %c0_47 = arith.constant 0 : index
    %c28 = arith.constant 28 : index
    %47 = vector.load %arg3[%c0_47, %c28] : memref<4x36xf32, #tpu.memory_space<vmem>>, vector<4x4xf32>
    %c0_48 = arith.constant 0 : index
    %c0_49 = arith.constant 0 : index
    %c37 = arith.constant 37 : index
    %48 = vector.load %arg1[%c0_48, %c0_49, %c37] : memref<1x4x326xf32, #tpu.memory_space<vmem>>, vector<1x4x288xf32>
    %49 = vector.shape_cast %48 : vector<1x4x288xf32> to vector<4x288xf32>
    %cst_50 = arith.constant dense<0.000000e+00> : vector<4x288xf32>
    %50 = tpu.matmul %47, %49, %cst_50 {dimension_numbers = #tpu.dot_dimension_numbers<[1], [0], [0], [1], [0, 0, 1, 1], [], []>} : vector<4x4xf32>, vector<4x288xf32>, vector<4x288xf32> -> vector<4x288xf32>
    %51 = arith.addf %46, %50 : vector<4x288xf32>
    %c0_51 = arith.constant 0 : index
    %c32 = arith.constant 32 : index
    %52 = vector.load %arg3[%c0_51, %c32] : memref<4x36xf32, #tpu.memory_space<vmem>>, vector<4x4xf32>
    %c0_52 = arith.constant 0 : index
    %c0_53 = arith.constant 0 : index
    %c38 = arith.constant 38 : index
    %53 = vector.load %arg1[%c0_52, %c0_53, %c38] : memref<1x4x326xf32, #tpu.memory_space<vmem>>, vector<1x4x288xf32>
    %54 = vector.shape_cast %53 : vector<1x4x288xf32> to vector<4x288xf32>
    %cst_54 = arith.constant dense<0.000000e+00> : vector<4x288xf32>
    %55 = tpu.matmul %52, %54, %cst_54 {dimension_numbers = #tpu.dot_dimension_numbers<[1], [0], [0], [1], [0, 0, 1, 1], [], []>} : vector<4x4xf32>, vector<4x288xf32>, vector<4x288xf32> -> vector<4x288xf32>
    %56 = arith.addf %51, %55 : vector<4x288xf32>
    %c1_i32 = arith.constant 1 : i32
    %57 = vector.broadcast %c1_i32 : i32 to vector<1x288xi32>
    %58 = arith.cmpi sge, %0, %57 : vector<1x288xi32>
    %c16_i32 = arith.constant 16 : i32
    %59 = vector.broadcast %c16_i32 : i32 to vector<1x288xi32>
    %60 = arith.cmpi sle, %0, %59 : vector<1x288xi32>
    %61 = arith.andi %58, %60 : vector<1x288xi1>
    %62 = arith.extui %61 : vector<1x288xi1> to vector<1x288xi32>
    %63 = arith.sitofp %62 : vector<1x288xi32> to vector<1x288xf32>
    %c0_55 = arith.constant 0 : index
    %c0_56 = arith.constant 0 : index
    %64 = vector.load %arg4[%c0_55, %c0_56] : memref<4x1xf32, #tpu.memory_space<vmem>>, vector<4x1xf32>
    %65 = vector.broadcast %63 : vector<1x288xf32> to vector<4x288xf32>
    %66 = arith.mulf %56, %65 : vector<4x288xf32>
    %cst_57 = arith.constant dense<0.000000e+00> : vector<4xf32>
    %67 = vector.multi_reduction <add>, %66, %cst_57 [1] : vector<4x288xf32> to vector<4xf32>
    %68 = vector.shape_cast %67 : vector<4xf32> to vector<4x1xf32>
    %69 = arith.mulf %66, %66 : vector<4x288xf32>
    %cst_58 = arith.constant dense<0.000000e+00> : vector<4xf32>
    %70 = vector.multi_reduction <add>, %69, %cst_58 [1] : vector<4x288xf32> to vector<4xf32>
    %71 = vector.shape_cast %70 : vector<4xf32> to vector<4x1xf32>
    %cst_59 = arith.constant 3.906250e-03 : f32
    %72 = vector.broadcast %cst_59 : f32 to vector<4x1xf32>
    %73 = arith.mulf %68, %72 : vector<4x1xf32>
    %cst_60 = arith.constant 2.560000e+02 : f32
    %74 = vector.broadcast %cst_60 : f32 to vector<4x1xf32>
    %75 = arith.mulf %74, %73 : vector<4x1xf32>
    %76 = arith.mulf %75, %73 : vector<4x1xf32>
    %77 = arith.subf %71, %76 : vector<4x1xf32>
    %cst_61 = arith.constant 0.000000e+00 : f32
    %78 = vector.broadcast %cst_61 : f32 to vector<4x1xf32>
    %79 = arith.maximumf %77, %78 : vector<4x1xf32>
    %80 = arith.addf %73, %64 : vector<4x1xf32>
    %cst_62 = arith.constant 0.00392156886 : f32
    %81 = vector.broadcast %cst_62 : f32 to vector<4x1xf32>
    %82 = arith.mulf %79, %81 : vector<4x1xf32>
    %cst_63 = arith.constant 9.99999997E-7 : f32
    %83 = vector.broadcast %cst_63 : f32 to vector<4x1xf32>
    %84 = arith.addf %82, %83 : vector<4x1xf32>
    %85 = math.rsqrt %84 : vector<4x1xf32>
    %86 = vector.shape_cast %80 : vector<4x1xf32> to vector<1x4x1xf32>
    %cst_64 = arith.constant dense<0.000000e+00> : vector<1xf32>
    %87 = vector.multi_reduction <add>, %86, %cst_64 [1, 2] : vector<1x4x1xf32> to vector<1xf32>
    %88 = vector.shape_cast %87 : vector<1xf32> to vector<1x1x1xf32>
    %89 = vector.extract %88[0, 0, 0] : f32 from vector<1x1x1xf32>
    %cst_65 = arith.constant 4.000000e+00 : f32
    %90 = arith.divf %89, %cst_65 : f32
    %91 = vector.shape_cast %79 : vector<4x1xf32> to vector<1x4x1xf32>
    %cst_66 = arith.constant dense<0.000000e+00> : vector<1xf32>
    %92 = vector.multi_reduction <add>, %91, %cst_66 [1, 2] : vector<1x4x1xf32> to vector<1xf32>
    %93 = vector.shape_cast %92 : vector<1xf32> to vector<1x1x1xf32>
    %94 = vector.extract %93[0, 0, 0] : f32 from vector<1x1x1xf32>
    %95 = vector.broadcast %90 : f32 to vector<4x1xf32>
    %96 = arith.subf %80, %95 : vector<4x1xf32>
    %97 = arith.mulf %96, %96 : vector<4x1xf32>
    %98 = vector.shape_cast %97 : vector<4x1xf32> to vector<1x4x1xf32>
    %cst_67 = arith.constant dense<0.000000e+00> : vector<1xf32>
    %99 = vector.multi_reduction <add>, %98, %cst_67 [1, 2] : vector<1x4x1xf32> to vector<1xf32>
    %100 = vector.shape_cast %99 : vector<1xf32> to vector<1x1x1xf32>
    %101 = vector.extract %100[0, 0, 0] : f32 from vector<1x1x1xf32>
    %cst_68 = arith.constant 2.560000e+02 : f32
    %102 = arith.mulf %cst_68, %101 : f32
    %103 = arith.addf %94, %102 : f32
    %cst_69 = arith.constant 9.77517105E-4 : f32
    %104 = arith.mulf %103, %cst_69 : f32
    %cst_70 = arith.constant 9.99999997E-7 : f32
    %105 = arith.addf %104, %cst_70 : f32
    %106 = math.rsqrt %105 : f32
    %107 = vector.broadcast %9 : f32 to vector<4x1xf32>
    %108 = arith.mulf %107, %85 : vector<4x1xf32>
    %cst_71 = arith.constant 1.000000e+00 : f32
    %109 = arith.subf %cst_71, %9 : f32
    %110 = arith.mulf %109, %106 : f32
    %111 = vector.broadcast %110 : f32 to vector<4x1xf32>
    %112 = arith.addf %108, %111 : vector<4x1xf32>
    %113 = arith.mulf %2, %112 : vector<4x1xf32>
    %114 = vector.broadcast %9 : f32 to vector<4x1xf32>
    %115 = arith.mulf %114, %80 : vector<4x1xf32>
    %116 = arith.mulf %115, %85 : vector<4x1xf32>
    %cst_72 = arith.constant 1.000000e+00 : f32
    %117 = arith.subf %cst_72, %9 : f32
    %118 = arith.mulf %117, %90 : f32
    %119 = arith.mulf %118, %106 : f32
    %120 = vector.broadcast %119 : f32 to vector<4x1xf32>
    %121 = arith.addf %116, %120 : vector<4x1xf32>
    %122 = arith.mulf %2, %121 : vector<4x1xf32>
    %123 = arith.subf %4, %122 : vector<4x1xf32>
    %124 = arith.mulf %64, %113 : vector<4x1xf32>
    %125 = arith.addf %123, %124 : vector<4x1xf32>
    %126 = vector.broadcast %113 : vector<4x1xf32> to vector<4x288xf32>
    %127 = arith.mulf %56, %126 : vector<4x288xf32>
    %128 = vector.broadcast %125 : vector<4x1xf32> to vector<4x288xf32>
    %129 = arith.addf %127, %128 : vector<4x288xf32>
    %cst_73 = arith.constant 0.000000e+00 : f32
    %130 = vector.broadcast %cst_73 : f32 to vector<4x288xf32>
    %131 = arith.maximumf %129, %130 : vector<4x288xf32>
    %c0_74 = arith.constant 0 : index
    %c18_75 = arith.constant 18 : index
    %132 = vector.load %arg11[%c0_74, %c18_75] : memref<4x326xf32, #tpu.memory_space<vmem>>, vector<4x288xf32>
    tpu.vector_store %arg11[%c0_74, %c18_75], %131 {strides = array<i32>} : memref<4x326xf32, #tpu.memory_space<vmem>>, vector<4x288xf32>,
    %c0_76 = arith.constant 0 : index
    %c20_77 = arith.constant 20 : index
    %133 = vector.load %arg11[%c0_76, %c20_77] : memref<4x326xf32, #tpu.memory_space<vmem>>, vector<4x288xf32>
    %c0_78 = arith.constant 0 : index
    %c16_79 = arith.constant 16 : index
    %134 = vector.load %arg11[%c0_78, %c16_79] : memref<4x326xf32, #tpu.memory_space<vmem>>, vector<4x288xf32>
    %c0_i32 = arith.constant 0 : i32
    %135 = vector.broadcast %c0_i32 : i32 to vector<1x288xi32>
    %136 = arith.cmpi eq, %0, %135 : vector<1x288xi32>
    %c17_i32 = arith.constant 17 : i32
    %137 = vector.broadcast %c17_i32 : i32 to vector<1x288xi32>
    %138 = arith.cmpi eq, %0, %137 : vector<1x288xi32>
    %139 = vector.shape_cast %138 : vector<1x288xi1> to vector<1x288xi1>
    %140 = vector.broadcast %139 : vector<1x288xi1> to vector<4x288xi1>
    %141 = arith.select %140, %134, %131 : vector<4x288xi1>, vector<4x288xf32>
    %142 = vector.shape_cast %136 : vector<1x288xi1> to vector<1x288xi1>
    %143 = vector.broadcast %142 : vector<1x288xi1> to vector<4x288xi1>
    %144 = arith.select %143, %133, %141 : vector<4x288xi1>, vector<4x288xf32>
    %c0_80 = arith.constant 0 : index
    %c18_81 = arith.constant 18 : index
    %145 = vector.load %arg11[%c0_80, %c18_81] : memref<4x326xf32, #tpu.memory_space<vmem>>, vector<4x288xf32>
    tpu.vector_store %arg11[%c0_80, %c18_81], %144 {strides = array<i32>} : memref<4x326xf32, #tpu.memory_space<vmem>>, vector<4x288xf32>,
    %c0_82 = arith.constant 0 : index
    %c36_83 = arith.constant 36 : index
    %146 = vector.load %arg11[%c0_82, %c36_83] : memref<4x326xf32, #tpu.memory_space<vmem>>, vector<4x18xf32>
    %c0_84 = arith.constant 0 : index
    %c0_85 = arith.constant 0 : index
    %147 = vector.load %arg11[%c0_84, %c0_85] : memref<4x326xf32, #tpu.memory_space<vmem>>, vector<4x18xf32>
    tpu.vector_store %arg11[%c0_84, %c0_85], %146 {strides = array<i32>} : memref<4x326xf32, #tpu.memory_space<vmem>>, vector<4x18xf32>,
    %c0_86 = arith.constant 0 : index
    %c270 = arith.constant 270 : index
    %148 = vector.load %arg11[%c0_86, %c270] : memref<4x326xf32, #tpu.memory_space<vmem>>, vector<4x18xf32>
    %c0_87 = arith.constant 0 : index
    %c306 = arith.constant 306 : index
    %149 = vector.load %arg11[%c0_87, %c306] : memref<4x326xf32, #tpu.memory_space<vmem>>, vector<4x18xf32>
    tpu.vector_store %arg11[%c0_87, %c306], %148 {strides = array<i32>} : memref<4x326xf32, #tpu.memory_space<vmem>>, vector<4x18xf32>,
    %cst_88 = arith.constant 0.000000e+00 : f32
    %150 = vector.broadcast %cst_88 : f32 to vector<4x2xf32>
    %c0_89 = arith.constant 0 : index
    %c324 = arith.constant 324 : index
    %151 = vector.load %arg11[%c0_89, %c324] : memref<4x326xf32, #tpu.memory_space<vmem>>, vector<4x2xf32>
    tpu.vector_store %arg11[%c0_89, %c324], %150 {strides = array<i32>} : memref<4x326xf32, #tpu.memory_space<vmem>>, vector<4x2xf32>,
    %c0_90 = arith.constant 0 : index
    %c0_91 = arith.constant 0 : index
    %152 = vector.load %arg5[%c0_90, %c0_91] : memref<4x36xf32, #tpu.memory_space<vmem>>, vector<4x4xf32>
    %c0_92 = arith.constant 0 : index
    %c0_93 = arith.constant 0 : index
    %153 = vector.load %arg11[%c0_92, %c0_93] : memref<4x326xf32, #tpu.memory_space<vmem>>, vector<4x288xf32>
    %cst_94 = arith.constant dense<0.000000e+00> : vector<4x288xf32>
    %154 = tpu.matmul %152, %153, %cst_94 {dimension_numbers = #tpu.dot_dimension_numbers<[1], [0], [0], [1], [0, 0, 1, 1], [], []>} : vector<4x4xf32>, vector<4x288xf32>, vector<4x288xf32> -> vector<4x288xf32>
    %c0_95 = arith.constant 0 : index
    %c4_96 = arith.constant 4 : index
    %155 = vector.load %arg5[%c0_95, %c4_96] : memref<4x36xf32, #tpu.memory_space<vmem>>, vector<4x4xf32>
    %c0_97 = arith.constant 0 : index
    %c1_98 = arith.constant 1 : index
    %156 = vector.load %arg11[%c0_97, %c1_98] : memref<4x326xf32, #tpu.memory_space<vmem>>, vector<4x288xf32>
    %cst_99 = arith.constant dense<0.000000e+00> : vector<4x288xf32>
    %157 = tpu.matmul %155, %156, %cst_99 {dimension_numbers = #tpu.dot_dimension_numbers<[1], [0], [0], [1], [0, 0, 1, 1], [], []>} : vector<4x4xf32>, vector<4x288xf32>, vector<4x288xf32> -> vector<4x288xf32>
    %158 = arith.addf %154, %157 : vector<4x288xf32>
    %c0_100 = arith.constant 0 : index
    %c8_101 = arith.constant 8 : index
    %159 = vector.load %arg5[%c0_100, %c8_101] : memref<4x36xf32, #tpu.memory_space<vmem>>, vector<4x4xf32>
    %c0_102 = arith.constant 0 : index
    %c2_103 = arith.constant 2 : index
    %160 = vector.load %arg11[%c0_102, %c2_103] : memref<4x326xf32, #tpu.memory_space<vmem>>, vector<4x288xf32>
    %cst_104 = arith.constant dense<0.000000e+00> : vector<4x288xf32>
    %161 = tpu.matmul %159, %160, %cst_104 {dimension_numbers = #tpu.dot_dimension_numbers<[1], [0], [0], [1], [0, 0, 1, 1], [], []>} : vector<4x4xf32>, vector<4x288xf32>, vector<4x288xf32> -> vector<4x288xf32>
    %162 = arith.addf %158, %161 : vector<4x288xf32>
    %c0_105 = arith.constant 0 : index
    %c12_106 = arith.constant 12 : index
    %163 = vector.load %arg5[%c0_105, %c12_106] : memref<4x36xf32, #tpu.memory_space<vmem>>, vector<4x4xf32>
    %c0_107 = arith.constant 0 : index
    %c18_108 = arith.constant 18 : index
    %164 = vector.load %arg11[%c0_107, %c18_108] : memref<4x326xf32, #tpu.memory_space<vmem>>, vector<4x288xf32>
    %cst_109 = arith.constant dense<0.000000e+00> : vector<4x288xf32>
    %165 = tpu.matmul %163, %164, %cst_109 {dimension_numbers = #tpu.dot_dimension_numbers<[1], [0], [0], [1], [0, 0, 1, 1], [], []>} : vector<4x4xf32>, vector<4x288xf32>, vector<4x288xf32> -> vector<4x288xf32>
    %166 = arith.addf %162, %165 : vector<4x288xf32>
    %c0_110 = arith.constant 0 : index
    %c16_111 = arith.constant 16 : index
    %167 = vector.load %arg5[%c0_110, %c16_111] : memref<4x36xf32, #tpu.memory_space<vmem>>, vector<4x4xf32>
    %c0_112 = arith.constant 0 : index
    %c19_113 = arith.constant 19 : index
    %168 = vector.load %arg11[%c0_112, %c19_113] : memref<4x326xf32, #tpu.memory_space<vmem>>, vector<4x288xf32>
    %cst_114 = arith.constant dense<0.000000e+00> : vector<4x288xf32>
    %169 = tpu.matmul %167, %168, %cst_114 {dimension_numbers = #tpu.dot_dimension_numbers<[1], [0], [0], [1], [0, 0, 1, 1], [], []>} : vector<4x4xf32>, vector<4x288xf32>, vector<4x288xf32> -> vector<4x288xf32>
    %170 = arith.addf %166, %169 : vector<4x288xf32>
    %c0_115 = arith.constant 0 : index
    %c20_116 = arith.constant 20 : index
    %171 = vector.load %arg5[%c0_115, %c20_116] : memref<4x36xf32, #tpu.memory_space<vmem>>, vector<4x4xf32>
    %c0_117 = arith.constant 0 : index
    %c20_118 = arith.constant 20 : index
    %172 = vector.load %arg11[%c0_117, %c20_118] : memref<4x326xf32, #tpu.memory_space<vmem>>, vector<4x288xf32>
    %cst_119 = arith.constant dense<0.000000e+00> : vector<4x288xf32>
    %173 = tpu.matmul %171, %172, %cst_119 {dimension_numbers = #tpu.dot_dimension_numbers<[1], [0], [0], [1], [0, 0, 1, 1], [], []>} : vector<4x4xf32>, vector<4x288xf32>, vector<4x288xf32> -> vector<4x288xf32>
    %174 = arith.addf %170, %173 : vector<4x288xf32>
    %c0_120 = arith.constant 0 : index
    %c24_121 = arith.constant 24 : index
    %175 = vector.load %arg5[%c0_120, %c24_121] : memref<4x36xf32, #tpu.memory_space<vmem>>, vector<4x4xf32>
    %c0_122 = arith.constant 0 : index
    %c36_123 = arith.constant 36 : index
    %176 = vector.load %arg11[%c0_122, %c36_123] : memref<4x326xf32, #tpu.memory_space<vmem>>, vector<4x288xf32>
    %cst_124 = arith.constant dense<0.000000e+00> : vector<4x288xf32>
    %177 = tpu.matmul %175, %176, %cst_124 {dimension_numbers = #tpu.dot_dimension_numbers<[1], [0], [0], [1], [0, 0, 1, 1], [], []>} : vector<4x4xf32>, vector<4x288xf32>, vector<4x288xf32> -> vector<4x288xf32>
    %178 = arith.addf %174, %177 : vector<4x288xf32>
    %c0_125 = arith.constant 0 : index
    %c28_126 = arith.constant 28 : index
    %179 = vector.load %arg5[%c0_125, %c28_126] : memref<4x36xf32, #tpu.memory_space<vmem>>, vector<4x4xf32>
    %c0_127 = arith.constant 0 : index
    %c37_128 = arith.constant 37 : index
    %180 = vector.load %arg11[%c0_127, %c37_128] : memref<4x326xf32, #tpu.memory_space<vmem>>, vector<4x288xf32>
    %cst_129 = arith.constant dense<0.000000e+00> : vector<4x288xf32>
    %181 = tpu.matmul %179, %180, %cst_129 {dimension_numbers = #tpu.dot_dimension_numbers<[1], [0], [0], [1], [0, 0, 1, 1], [], []>} : vector<4x4xf32>, vector<4x288xf32>, vector<4x288xf32> -> vector<4x288xf32>
    %182 = arith.addf %178, %181 : vector<4x288xf32>
    %c0_130 = arith.constant 0 : index
    %c32_131 = arith.constant 32 : index
    %183 = vector.load %arg5[%c0_130, %c32_131] : memref<4x36xf32, #tpu.memory_space<vmem>>, vector<4x4xf32>
    %c0_132 = arith.constant 0 : index
    %c38_133 = arith.constant 38 : index
    %184 = vector.load %arg11[%c0_132, %c38_133] : memref<4x326xf32, #tpu.memory_space<vmem>>, vector<4x288xf32>
    %cst_134 = arith.constant dense<0.000000e+00> : vector<4x288xf32>
    %185 = tpu.matmul %183, %184, %cst_134 {dimension_numbers = #tpu.dot_dimension_numbers<[1], [0], [0], [1], [0, 0, 1, 1], [], []>} : vector<4x4xf32>, vector<4x288xf32>, vector<4x288xf32> -> vector<4x288xf32>
    %186 = arith.addf %182, %185 : vector<4x288xf32>
    %c16_i32_135 = arith.constant 16 : i32
    %187 = vector.broadcast %c16_i32_135 : i32 to vector<1x288xi32>
    %188 = arith.cmpi slt, %0, %187 : vector<1x288xi32>
    %189 = arith.extui %188 : vector<1x288xi1> to vector<1x288xi32>
    %190 = arith.sitofp %189 : vector<1x288xi32> to vector<1x288xf32>
    %c0_136 = arith.constant 0 : index
    %c0_137 = arith.constant 0 : index
    %191 = vector.load %arg6[%c0_136, %c0_137] : memref<4x1xf32, #tpu.memory_space<vmem>>, vector<4x1xf32>
    %192 = vector.broadcast %190 : vector<1x288xf32> to vector<4x288xf32>
    %193 = arith.mulf %186, %192 : vector<4x288xf32>
    %cst_138 = arith.constant dense<0.000000e+00> : vector<4xf32>
    %194 = vector.multi_reduction <add>, %193, %cst_138 [1] : vector<4x288xf32> to vector<4xf32>
    %195 = vector.shape_cast %194 : vector<4xf32> to vector<4x1xf32>
    %196 = arith.mulf %193, %193 : vector<4x288xf32>
    %cst_139 = arith.constant dense<0.000000e+00> : vector<4xf32>
    %197 = vector.multi_reduction <add>, %196, %cst_139 [1] : vector<4x288xf32> to vector<4xf32>
    %198 = vector.shape_cast %197 : vector<4xf32> to vector<4x1xf32>
    %cst_140 = arith.constant 3.906250e-03 : f32
    %199 = vector.broadcast %cst_140 : f32 to vector<4x1xf32>
    %200 = arith.mulf %195, %199 : vector<4x1xf32>
    %cst_141 = arith.constant 2.560000e+02 : f32
    %201 = vector.broadcast %cst_141 : f32 to vector<4x1xf32>
    %202 = arith.mulf %201, %200 : vector<4x1xf32>
    %203 = arith.mulf %202, %200 : vector<4x1xf32>
    %204 = arith.subf %198, %203 : vector<4x1xf32>
    %cst_142 = arith.constant 0.000000e+00 : f32
    %205 = vector.broadcast %cst_142 : f32 to vector<4x1xf32>
    %206 = arith.maximumf %204, %205 : vector<4x1xf32>
    %207 = arith.addf %200, %191 : vector<4x1xf32>
    %cst_143 = arith.constant 0.00392156886 : f32
    %208 = vector.broadcast %cst_143 : f32 to vector<4x1xf32>
    %209 = arith.mulf %206, %208 : vector<4x1xf32>
    %cst_144 = arith.constant 9.99999997E-7 : f32
    %210 = vector.broadcast %cst_144 : f32 to vector<4x1xf32>
    %211 = arith.addf %209, %210 : vector<4x1xf32>
    %212 = math.rsqrt %211 : vector<4x1xf32>
    %213 = vector.shape_cast %207 : vector<4x1xf32> to vector<1x4x1xf32>
    %cst_145 = arith.constant dense<0.000000e+00> : vector<1xf32>
    %214 = vector.multi_reduction <add>, %213, %cst_145 [1, 2] : vector<1x4x1xf32> to vector<1xf32>
    %215 = vector.shape_cast %214 : vector<1xf32> to vector<1x1x1xf32>
    %216 = vector.extract %215[0, 0, 0] : f32 from vector<1x1x1xf32>
    %cst_146 = arith.constant 4.000000e+00 : f32
    %217 = arith.divf %216, %cst_146 : f32
    %218 = vector.shape_cast %206 : vector<4x1xf32> to vector<1x4x1xf32>
    %cst_147 = arith.constant dense<0.000000e+00> : vector<1xf32>
    %219 = vector.multi_reduction <add>, %218, %cst_147 [1, 2] : vector<1x4x1xf32> to vector<1xf32>
    %220 = vector.shape_cast %219 : vector<1xf32> to vector<1x1x1xf32>
    %221 = vector.extract %220[0, 0, 0] : f32 from vector<1x1x1xf32>
    %222 = vector.broadcast %217 : f32 to vector<4x1xf32>
    %223 = arith.subf %207, %222 : vector<4x1xf32>
    %224 = arith.mulf %223, %223 : vector<4x1xf32>
    %225 = vector.shape_cast %224 : vector<4x1xf32> to vector<1x4x1xf32>
    %cst_148 = arith.constant dense<0.000000e+00> : vector<1xf32>
    %226 = vector.multi_reduction <add>, %225, %cst_148 [1, 2] : vector<1x4x1xf32> to vector<1xf32>
    %227 = vector.shape_cast %226 : vector<1xf32> to vector<1x1x1xf32>
    %228 = vector.extract %227[0, 0, 0] : f32 from vector<1x1x1xf32>
    %cst_149 = arith.constant 2.560000e+02 : f32
    %229 = arith.mulf %cst_149, %228 : f32
    %230 = arith.addf %221, %229 : f32
    %cst_150 = arith.constant 9.77517105E-4 : f32
    %231 = arith.mulf %230, %cst_150 : f32
    %cst_151 = arith.constant 9.99999997E-7 : f32
    %232 = arith.addf %231, %cst_151 : f32
    %233 = math.rsqrt %232 : f32
    %234 = vector.broadcast %12 : f32 to vector<4x1xf32>
    %235 = arith.mulf %234, %212 : vector<4x1xf32>
    %cst_152 = arith.constant 1.000000e+00 : f32
    %236 = arith.subf %cst_152, %12 : f32
    %237 = arith.mulf %236, %233 : f32
    %238 = vector.broadcast %237 : f32 to vector<4x1xf32>
    %239 = arith.addf %235, %238 : vector<4x1xf32>
    %240 = arith.mulf %2, %239 : vector<4x1xf32>
    %241 = vector.broadcast %12 : f32 to vector<4x1xf32>
    %242 = arith.mulf %241, %207 : vector<4x1xf32>
    %243 = arith.mulf %242, %212 : vector<4x1xf32>
    %cst_153 = arith.constant 1.000000e+00 : f32
    %244 = arith.subf %cst_153, %12 : f32
    %245 = arith.mulf %244, %217 : f32
    %246 = arith.mulf %245, %233 : f32
    %247 = vector.broadcast %246 : f32 to vector<4x1xf32>
    %248 = arith.addf %243, %247 : vector<4x1xf32>
    %249 = arith.mulf %2, %248 : vector<4x1xf32>
    %250 = arith.subf %4, %249 : vector<4x1xf32>
    %251 = arith.mulf %191, %240 : vector<4x1xf32>
    %252 = arith.addf %250, %251 : vector<4x1xf32>
    %253 = vector.broadcast %240 : vector<4x1xf32> to vector<4x288xf32>
    %254 = arith.mulf %186, %253 : vector<4x288xf32>
    %255 = vector.broadcast %252 : vector<4x1xf32> to vector<4x288xf32>
    %256 = arith.addf %254, %255 : vector<4x288xf32>
    %c0_154 = arith.constant 0 : index
    %c0_155 = arith.constant 0 : index
    %c0_156 = arith.constant 0 : index
    %257 = vector.load %arg10[%c0_154, %c0_155, %c0_156] : memref<1x4x288xf32, #tpu.memory_space<vmem>>, vector<1x4x288xf32>
    %258 = vector.shape_cast %257 : vector<1x4x288xf32> to vector<4x288xf32>
    %259 = vector.shape_cast %256 : vector<4x288xf32> to vector<1x4x288xf32>
    tpu.vector_store %arg10[%c0_154, %c0_155, %c0_156], %259 {strides = array<i32>} : memref<1x4x288xf32, #tpu.memory_space<vmem>>, vector<1x4x288xf32>,
    return
  }
  func.func @transform_0(%arg0: i32) -> (i32, i32, i32) {
    %c0_i32 = arith.constant 0 : i32
    %c0_i32_0 = arith.constant 0 : i32
    %c0_i32_1 = arith.constant 0 : i32
    return %arg0, %c0_i32, %c0_i32_0 : i32, i32, i32
  }
  func.func @transform_1(%arg0: i32) -> (i32, i32) {
    %c0_i32 = arith.constant 0 : i32
    %c0_i32_0 = arith.constant 0 : i32
    %c0_i32_1 = arith.constant 0 : i32
    return %c0_i32, %c0_i32_0 : i32, i32
  }
  func.func @transform_2(%arg0: i32) -> (i32, i32) {
    %c0_i32 = arith.constant 0 : i32
    %c0_i32_0 = arith.constant 0 : i32
    %c0_i32_1 = arith.constant 0 : i32
    return %c0_i32, %c0_i32_0 : i32, i32
  }
  func.func @transform_3(%arg0: i32) -> (i32, i32) {
    %c0_i32 = arith.constant 0 : i32
    %c0_i32_0 = arith.constant 0 : i32
    %c0_i32_1 = arith.constant 0 : i32
    return %c0_i32, %c0_i32_0 : i32, i32
  }
  func.func @transform_4(%arg0: i32) -> (i32, i32) {
    %c0_i32 = arith.constant 0 : i32
    %c0_i32_0 = arith.constant 0 : i32
    %c0_i32_1 = arith.constant 0 : i32
    return %c0_i32, %c0_i32_0 : i32, i32
  }
  func.func @transform_5(%arg0: i32) -> (i32, i32) {
    %c0_i32 = arith.constant 0 : i32
    %c0_i32_0 = arith.constant 0 : i32
    %c0_i32_1 = arith.constant 0 : i32
    return %c0_i32, %c0_i32_0 : i32, i32
  }
  func.func @transform_6(%arg0: i32) -> (i32, i32, i32) {
    %c0_i32 = arith.constant 0 : i32
    %c0_i32_0 = arith.constant 0 : i32
    %c0_i32_1 = arith.constant 0 : i32
    return %arg0, %c0_i32, %c0_i32_0 : i32, i32, i32
  }
  func.func @transform_7(%arg0: i32) -> (i32, i32, i32) {
    %c0_i32 = arith.constant 0 : i32
    %c0_i32_0 = arith.constant 0 : i32
    %c0_i32_1 = arith.constant 0 : i32
    return %arg0, %c0_i32, %c0_i32_0 : i32, i32, i32
  }
  func.func @transform_8(%arg0: i32) -> (i32, i32) {
    %c0_i32 = arith.constant 0 : i32
    %c0_i32_0 = arith.constant 0 : i32
    %c0_i32_1 = arith.constant 0 : i32
    return %c0_i32, %c0_i32_0 : i32, i32
  }
  func.func @transform_9(%arg0: i32) -> (i32, i32, i32) {
    %c0_i32 = arith.constant 0 : i32
    %c0_i32_0 = arith.constant 0 : i32
    %c0_i32_1 = arith.constant 0 : i32
    return %arg0, %c0_i32, %c0_i32_0 : i32, i32, i32
  }
}

</mosaic_0001>

<bundles_post_ra>
// kernel: tpu_custom_call.1
= control target key start
LH: loop header
LB: loop body
LE: loop exit
PB: predicated region body
PF: predicated region fallthrough
CT: control target
= control target key end

     0   :  { %s5219_s0 = inlined_call_operand.vmem [shape: f32[2,4,326], index: 0, kind: input, shape index: {}]   ;;  %s5220_s1 = inlined_call_operand.hbm [shape: s32[1,288], index: 1, kind: input, shape index: {}]   ;;  %s5221_s2 = inlined_call_operand.vmem [shape: f32[4,36], index: 2, kind: input, shape index: {}]   ;;  %s5222_s3 = inlined_call_operand.vmem [shape: f32[4,1], index: 3, kind: input, shape index: {}]   ;;  %s5223_s4 = inlined_call_operand.vmem [shape: f32[4,36], index: 4, kind: input, shape index: {}]   ;;  %s5224_s5 = inlined_call_operand.vmem [shape: f32[4,1], index: 5, kind: input, shape index: {}]   ;;  %s5225_s6 = inlined_call_operand.vmem [shape: f32[2,4,1], index: 6, kind: input, shape index: {}]   ;;  %s5226_s7 = inlined_call_operand.vmem [shape: f32[2,4,1], index: 7, kind: input, shape index: {}]   ;;  %s5227_s8 = inlined_call_operand.vmem [shape: f32[1,2], index: 8, kind: input, shape index: {}]   ;;  %s5228_s9 = inlined_call_operand.hbm [shape: f32[2,4,288], index: 9, kind: output, shape index: {}]  }
   0x1   :  { %5263 = sst [smem:[#allocation12_spill]] %s5219_s0 }
   0x2   :  { %5264 = sst [smem:[#allocation13_spill]] %s5220_s1 }
   0x3   :  { %5265 = sst [smem:[#allocation14_spill]] %s5221_s2 }
   0x4   :  { %5266 = sst [smem:[#allocation15_spill]] %s5222_s3 }
   0x5   :  { %5267 = sst [smem:[#allocation16_spill]] %s5227_s8 }
   0x6   :  { %14 = vsyncpa [#allocation4], 0 }
   0x7   :  { %15 = vsyncpa [#allocation6], 0 }
   0x8   :  { %16 = vsyncpa [#allocation5], 0 }
   0x9   :  { %18 = vsyncpa [#allocation5 + $0x1], 0  ;;  %s4516_s30 = smov 0   ;;  %s4518_s10 = smov 0  }
   0xa   :  { %s4520_s11 = smov 0   ;;  %s4522_s12 = smov 0  }
   0xb LB: > { %s4537_s13 = sadd.s32 4294967295, %s4439_s12   ;;  %s3913_s14 = sadd.s32 4294967294, %s4439_s12   ;;  %s4439_s12 = sphi %s4522_s12, %s5319_s12   ;;  %s4435_s11 = sphi %s4520_s11, %s5318_s11   ;;  %s4431_s10 = sphi %s4518_s10, %s5317_s10   ;;  %s4427_s30 = sphi %s4516_s30, %s5316_s30  }
   0xc   : > { %s4541_s15 = sadd.s32 1, %s4439_s12   ;;  %s235_s16 = sadd.s32 1, %s4435_s11 }
   0xd   : > { %s232_s17 = ssub.s32 %s4439_s12, %s4541_s15  ;;  %p245_p0 = scmp.ne.s32.totalorder %s4435_s11, %s4431_s10 }
   0xe   : > { %p233_p1 = scmp.eq.s32.totalorder %s232_s17, 0  ;;  %p246_p2 = scmp.eq.s32.totalorder %s4537_s13, 1 }
   0xf   : > { %p251_p3 = scmp.ne.s32.totalorder %s4431_s10, %s4427_s30  ;;  %p252_p4 = scmp.eq.s32.totalorder %s3913_s14, 1 }
  0x10   : > { %s4552_s18 = scalar_select %p233_p1, %s4435_s11, %s235_s16  }
  0x11   : > { %p4554_p5 = por %p246_p2, %p245_p0  ;;  %p4558_p6 = por %p252_p4, %p251_p3 }
  0x12   : > { %p3914_p7 = scmp.ge.s32.totalorder %s4439_s12, 1  ;;  %p259_p8 = scmp.lt.s32.totalorder %s4439_s12, 3 }
  0x13   : > { %s5268_s19 = scalar_select %p4554_p5, 1, 0 }
  0x14   : > { %s5269_s20 = scalar_select %p4558_p6, 1, 0 }
  0x15   : > { %p5229_p9 = scmp.eq.s32.totalorder %s4537_s13, 0  ;;  %p4565_p10 = pnand %p3914_p7, %p259_p8 }
  0x16   : > { %s4441_s22 = smov [#allocation3]   ;;  %s5271_s8 = sld [smem:[#allocation16_spill]] }
  0x17   : > { %s5270_s21 = scalar_select %p4565_p10, 1, 0 }
  0x18   : > { %s272_s23 = sshll.u32 %s4441_s22, 4  ;;  %p4241_p11 = pneg %p4565_p10  ;;  %s273_s23 = int_to_ptr.vmem [resolvable:$true] %s272_s23 }
  0x19   : > { %s5273_s1 = sld [smem:[#allocation13_spill]] }
  0x1a   : > { %p4576_p12 = pnand %p5229_p9, %p4241_p11 }
  0x1c   : > { %s295_s26 = sshll.u32 %s5271_s8, 4  ;;  %p4328_p0 = pneg %p4576_p12  ;;  %s4580_s26 = int_to_ptr.vmem [resolvable:$true] %s295_s26 }
  0x1f   : > { %s4326_s14 = scalar_lea.hbm %s5273_s1, 48 }
  0x20   : > { %p4327_p13 = scmp.ne.s32.totalorder %s5273_s1, %s4326_s14  ;;  %p4333_p3 = scmp.lt.u32.totalorder %s4326_s14, %s5273_s1 }
  0x22   : > { %p4329_p1 = pnand %p4328_p0, %p4327_p13 }
  0x24   : > { %p4330_p2 = pneg %p4329_p1 }
  0x26   : > { %p4335_p4 = pnand %p4333_p3, %p4330_p2 }
  0x28   : > { %4338 = shalt.err (!%p4335_p4)
}
  0x29   : > { %s4339_s25 = scalar_lea.vmem %s273_s23, 48  ;;  %s4346_s28 = scalar_lea.vmem %s273_s23, 64 }
  0x2a   : > { %p4340_p7 = scmp.ne.s32.totalorder %s273_s23, %s4339_s25  ;;  %p4347_p9 = scmp.lt.s32.totalorder %s273_s23, %s273_s23 }
  0x2b   : > { %p4348_p6 = scmp.lt.s32.totalorder %s4346_s28, %s4339_s25 }
  0x2c   : > { %p4342_p8 = pnand %p4340_p7, %p4328_p0 }
  0x2d   : > { %p4349_p5 = por %p4348_p6, %p4347_p9 }
  0x2e   : > { %p4343_p11 = pneg %p4342_p8 }
  0x30   : > { %p4350_p10 = pnand %p4349_p5, %p4343_p11 }
  0x32   : > { %4353 = shalt.err (!%p4350_p10)
}
  0x33   : > { %4244 = dma.hbm_to_vmem [thread:$0]  (!%p4576_p12), %s5273_s1, 48, %s273_s23, [#allocation4]  }
  0x34   : > { %s4354_s14 = scalar_lea.vmem %s4580_s26, 16  ;;  %p4362_p6 = scmp.lt.s32.totalorder %s4580_s26, %s4580_s26 }
  0x35   : > { %p4355_p13 = scmp.ne.s32.totalorder %s4580_s26, %s4354_s14  ;;  %p4363_p5 = scmp.lt.s32.totalorder %s4354_s14, %s4354_s14 }
  0x37   : > { %p4357_p1 = pnand %p4355_p13, %p4328_p0  ;;  %p4364_p9 = por %p4363_p5, %p4362_p6 }
  0x39   : > { %p4358_p2 = pneg %p4357_p1 }
  0x3b   : > { %p4365_p10 = pnand %p4364_p9, %p4358_p2 }
  0x3d   : > { %4368 = shalt.err (!%p4365_p10)
}
  0x3e   : > { %s4442_s17 = smov [#allocation7]   ;;  %p5274_p3 = scmp.ne.s32.totalorder %s5270_s21, 0 }
  0x3f   : > { %4247 = dma.vmem_to_smem (!%p4576_p12), %s4580_s26, 16, %s4442_s17, [#allocation6]  }
  0x40   : > { %330 = sbr.rel (%p5274_p3) target bundleno = 2982 (0xba6), region = 56  ;;  %p5275_p4 = scmp.eq.s32.totalorder (!%p5274_p3), %s4537_s13, 0 }
  0x47   : > { %4414 = dma.done.wait (%p5275_p4), [#allocation4], 48   ;;  %p5276_p0 = pmov %p5275_p4 }
  0x49   : > { %4416 = vsyncadd (%p5276_p0), [#allocation4], 4294967248  ;;  %p5277_p7 = pmov %p5276_p0 }
  0x4a   : > { %p5278_p8 = pmov %p5276_p0 }
  0x4b   : > { %4418 = dma.done.wait (%p5277_p7), [#allocation6], 16  }
  0x4c   : > { %4420 = vsyncadd (%p5278_p8), [#allocation6], 4294967280 }
  0x4d   : > { %340 = sfence }
  0x4e   : > { %p379_p11 = scmp.lt.s32.totalorder %s4537_s13, 1  ;;  %v4443_v0 = vmov 0.0   ;;  %vm4444_vm0 = vmmov 0   ;;  %s5279_s0 = sld [smem:[#allocation12_spill]]  ;;  %vm424_vm1 = vcmask 1043456   ;;  %vm418_vm2 = vcmask 1039360  }
  0x4f   : > { %4058 = vmatprep.subr.mxu1 %v4443_v0  ;;  %495 = vmatprep.mubr.f32.mxu0 %v4443_v0  ;;  %s5242_s24 = smov 127   ;;  %s5280_s2 = sld [smem:[#allocation14_spill]]  ;;  %vm421_vm3 = vcmask 31744   ;;  %vm736_vm4 = vcmask 1031168   ;;  %vm906_vm5 = vcmask 900096   ;;  %vm5262_vm6 = vcmask 891904  }
  0x50   : > { %s4626_s23 = scalar_select %p379_p11, %s4537_s13, 1  ;;  %4060 = vmatprep.mubr.msk.f32.mxu1 %vm4444_vm0, %v4443_v0  ;;  %vm1246_vm7 = vcmask 883712   ;;  %vm5261_vm8 = vcmask 752640   ;;  %vm5260_vm9 = vcmask 744448   ;;  %vm5259_vm10 = vcmask 736256  }
  0x51   : > { %s5240_s29 = smov 124   ;;  %s5238_s16 = smov 126   ;;  %vm5258_vm14 = vcmask 257024   ;;  %vm5257_vm15 = vcmask 3072  }
  0x52   : > { %s4213_s21 = smul.u32 12, %s4626_s23  ;;  %s5234_s26 = smov 110  }
  0x53   : > { %s5233_s28 = smov 116   ;;  %s5236_s14 = smov 109  }
  0x54   : > { %s4636_s22 = scalar_lea.vmem %s5279_s0, %s4213_s21  ;;  %s5232_s21 = smov 120  }
  0x55   : > { %v4639_v1 = vld [vmem:[%s4636_s22] sm:$0xff]  ;;  %v4655_v4 = vld [vmem:[%s4636_s22 + $0x8] sm:$0xf]  ;;  %s5254_s27 = smov 112   ;;  %s5252_s25 = smov 108  }
  0x56   : > { %412 = vrot.lane.b32.xlu1 %v4639_v1, %s5242_s24  ;;  %v4645_v2 = vcombine.high %v4639_v1, %v4639_v1  ;;  %v4650_v3 = vld [vmem:[%s5280_s2] sm:$0xf]  ;;  %v723_v5 = vld [vmem:[%s4636_s22 + $0x8] sm:$0xf]  ;;  %s5245_s17 = smov 90   ;;  %s5281_s3 = sld [smem:[#allocation15_spill]] }
  0x57   : > { %v721_v6 = vld [vmem:[%s5280_s2] sm:$0xf]  ;;  %v893_v7 = vld [vmem:[%s4636_s22 + $0x8] sm:$0xf]  ;;  %s4462_s0 = smov 1.0   ;;  %s4463_s1 = smov 18  }
  0x58   : > { %414 = vrot.lane.b32.xlu0 %v4645_v2, %s5242_s24  ;;  %v891_v8 = vld [vmem:[%s5280_s2] sm:$0xf]  ;;  %v1063_v9 = vld [vmem:[%s4636_s22 + $0x8] sm:$0xf]  ;;  %p5314_p13 = scmp.ne.s32.totalorder %s5268_s19, 0 }
  0x59   : > { %v1061_v10 = vld [vmem:[%s5280_s2] sm:$0xf]  ;;  %v1233_v11 = vld [vmem:[%s4636_s22 + $0x8] sm:$0xf] }
  0x5a   : > { %407 = vrot.lane.b32.xlu1 %v4650_v3, %s5240_s29  ;;  %v1231_v12 = vld [vmem:[%s5280_s2] sm:$0xf]  ;;  %v1403_v13 = vld [vmem:[%s4636_s22 + $0x8] sm:$0xf]  ;;  %s5244_s29 = smov 96  }
  0x5b   : > { %v1401_v14 = vld [vmem:[%s5280_s2] sm:$0xf]  ;;  %v1573_v15 = vld [vmem:[%s4636_s22 + $0x8] sm:$0xf] }
  0x5c   : > { %416 = vrot.lane.b32.xlu0 %v4655_v4, %s5242_s24  ;;  %v1571_v16 = vld [vmem:[%s5280_s2] sm:$0xf]  ;;  %v1743_v17 = vld [vmem:[%s4636_s22 + $0x8] sm:$0xf] }
  0x5d   : > { %v1741_v18 = vld [vmem:[%s5280_s2] sm:$0xf] }
  0x5e   : > { %734 = vrot.lane.b32.xlu1 %v723_v5, %s5238_s16  ;;  %v1918_v5 = vlaneseq }
  0x60   : > { %732 = vrot.lane.b32.xlu0 %v4645_v2, %s5238_s16 }
  0x62   : > { %725 = vrot.lane.b32.xlu1 %v721_v6, %s5232_s21  ;;  %s5250_s21 = smov 92   ;;  %v1919_v6 = vshrl.u32 %v1918_v5, 7 }
  0x64   : > { %730 = vrot.lane.b32.xlu0 %v4639_v1, %s5238_s16 }
  0x66   : > { %904 = vrot.lane.b32.xlu1 %v893_v7, %s5234_s26  ;;  %v4837_v7 = vsub.s32 2, %v1919_v6 }
  0x68   : > { %902 = vrot.lane.b32.xlu0 %v4645_v2, %s5234_s26 }
  0x6a   : > { %895 = vrot.lane.b32.xlu1 %v891_v8, %s5233_s28  ;;  %s5248_s28 = smov 91  }
  0x6c   : > { %900 = vrot.lane.b32.xlu0 %v4639_v1, %s5234_s26  ;;  %s5241_s26 = smov 104  }
  0x6e   : > { %1074 = vrot.lane.b32.xlu1 %v1063_v9, %s5236_s14  ;;  %v4840_v9 = vsub.s32 0, %v1919_v6 }
  0x70   : > { %1072 = vrot.lane.b32.xlu0 %v4645_v2, %s5236_s14 }
  0x72   : > { %1065 = vrot.lane.b32.xlu1 %v1061_v10, %s5254_s27  ;;  %v4842_v10 = vsub.s32 1, %v1919_v6  ;;  %s4461_s27 = smov 0.0  }
  0x74   : > { %1070 = vrot.lane.b32.xlu0 %v4639_v1, %s5236_s14  ;;  %s5247_s14 = smov 100  }
  0x76   : > { %1244 = vrot.lane.b32.xlu1 %v1233_v11, %s5252_s25 }
  0x78   : > { %1242 = vrot.lane.b32.xlu0 %v4645_v2, %s5252_s25 }
  0x7a   : > { %1235 = vrot.lane.b32.xlu1 %v1231_v12, %s5252_s25 }
  0x7c   : > { %1240 = vrot.lane.b32.xlu0 %v4639_v1, %s5252_s25 }
  0x7e   : > { %1414 = vrot.lane.b32.xlu1 %v1403_v13, %s5250_s21 }
  0x80   : > { %1412 = vrot.lane.b32.xlu0 %v4645_v2, %s5250_s21 }
  0x82   : > { %1405 = vrot.lane.b32.xlu1 %v1401_v14, %s5241_s26 }
  0x84   : > { %1410 = vrot.lane.b32.xlu0 %v4639_v1, %s5250_s21  ;;  %s395_s21 = sld [smem:[#allocation7]] }
  0x86   : > { %1584 = vrot.lane.b32.xlu1 %v1573_v15, %s5248_s28 }
  0x88   : > { %1582 = vrot.lane.b32.xlu0 %v4645_v2, %s5248_s28 }
  0x8a   : > { %1575 = vrot.lane.b32.xlu1 %v1571_v16, %s5247_s14  ;;  %s3925_s25 = sadd.f32 -0.1, %s395_s21 }
  0x8c   : > { %1580 = vrot.lane.b32.xlu0 %v4639_v1, %s5248_s28 }
  0x8e   : > { %1754 = vrot.lane.b32.xlu1 %v1743_v17, %s5245_s17 }
  0x90   : > { %1752 = vrot.lane.b32.xlu0 %v4645_v2, %s5245_s17 }
  0x92   : > { %1745 = vrot.lane.b32.xlu1 %v1741_v18, %s5244_s29 }
  0x94   : > { %1750 = vrot.lane.b32.xlu0 %v4639_v1, %s5245_s17 }
  0xc8   : > { %v413_v19 = vpop.permute.xlu1 %412 }
  0xca   : > { %v415_v20 = vpop.permute.xlu0 %414 }
  0xcb   : > { %v419_v24 = vsel %vm418_vm2, %v413_v19, %v415_v20 }
  0xcc   : > { %v408_v21 = vpop.permute.xlu1 %407 }
  0xce   : > { %v417_v22 = vpop.permute.xlu0 %416 }
  0xcf   : > { %4059 = vmatpush3.msk.msra.mxu1 %vm424_vm1, %v417_v22  ;;  %v420_v23 = vsel %vm418_vm2, %v415_v20, %v417_v22 }
  0xd0   : > { %3927 = vmatprep.subr.msk.mxu0 %vm424_vm1, %v420_v23  ;;  %4061 = vmatmul.mubr.msk.f32.vlgmr.msra.gmra.mrb[0].mxu1 %vm421_vm3, %v408_v21  ;;  %v735_v25 = vpop.permute.xlu1 %734 }
  0xd1   : > { %3928 = vmatpush1.msk.msra.mxu0 %vm424_vm1, %v419_v24  ;;  %4063 = vmatprep.subr.mxu1 %v4443_v0 }
  0xd2   : > { %3929 = vmatmul.mubr.msk.f32.vlgmr.msra.gmra.mrb[0].mxu0 %vm421_vm3, %v408_v21  ;;  %v733_v26 = vpop.permute.xlu0 %732  ;;  %3932 = vmatprep.subr.msk.mxu0 %vm424_vm1, %v4645_v2 }
  0xd3   : > { %3933 = vmatpush1.msk.msra.mxu0 %vm424_vm1, %v4639_v1  ;;  %v738_v27 = vsel %vm736_vm4, %v733_v26, %v735_v25  ;;  %4064 = vmatpush3.msk.msra.mxu1 %vm424_vm1, %v4655_v4  ;;  %v4833_v4 = vld [vmem:[#allocation3] sm:$0x7] }
  0xd4   : > { %4065 = vmatprep.mubr.msk.f32.mxu1 %vm4444_vm0, %v4443_v0  ;;  %644 = vmatprep.mubr.f32.mxu0 %v4443_v0  ;;  %v726_v28 = vpop.permute.xlu1 %725  ;;  %vm1911_vm11 = vcmp.ge.s32.totalorder %v4833_v4, 1  ;;  %vm1912_vm12 = vcmp.le.s32.totalorder %v4833_v4, 16 }
  0xd5   : > { %3937 = vmatprep.subr.msk.mxu0 %vm424_vm1, %v738_v27  ;;  %4068 = vmatprep.subr.mxu1 %v4443_v0  ;;  %vm1913_vm13 = vmand %vm1911_vm11, %vm1912_vm12  ;;  %vm2057_vm11 = vcmask 1043600   ;;  %vm2058_vm12 = vcmask 1047556  }
  0xd6   : > { %v731_v29 = vpop.permute.xlu0 %730  ;;  %v3972_v8 = vsel %vm1913_vm13, 1.0, %v4443_v0  ;;  %vm2052_vm13 = vcmask 146432  }
  0xd7   : > { %v737_v30 = vsel %vm736_vm4, %v731_v29, %v733_v26  ;;  %v1929_v11 = vrot.slane %v3972_v8, %v4837_v7  ;;  %v1921_v12 = vrot.slane %v3972_v8, %v4840_v9  ;;  %v1925_v14 = vrot.slane %v3972_v8, %v4842_v10 }
  0xd8   : > { %4066 = vmatmul.mubr.msk.f32.vlgmr.msra.gmra.mrb[0].mxu1 %vm421_vm3, %v4650_v3  ;;  %v905_v31 = vpop.permute.xlu1 %904 }
  0xd9   : > { %4069 = vmatpush3.msk.msra.mxu1 %vm424_vm1, %v735_v25  ;;  %4070 = vmatprep.mubr.msk.f32.mxu1 %vm4444_vm0, %v4443_v0 }
  0xda   : > { %3934 = vmatmul.mubr.msk.f32.vlgmr.msra.gmra.mrb[0].mxu0 %vm421_vm3, %v4650_v3  ;;  %v903_v32 = vpop.permute.xlu0 %902  ;;  %4073 = vmatprep.subr.mxu1 %v4443_v0 }
  0xdb   : > { %3938 = vmatpush1.msk.msra.mxu0 %vm424_vm1, %v737_v30  ;;  %v908_v33 = vsel %vm906_vm5, %v903_v32, %v905_v31  ;;  %811 = vmatprep.mubr.f32.mxu0 %v4443_v0 }
  0xdc   : > { %3942 = vmatprep.subr.msk.mxu0 %vm424_vm1, %v908_v33  ;;  %v896_v34 = vpop.permute.xlu1 %895 }
  0xde   : > { %v901_v35 = vpop.permute.xlu0 %900 }
  0xdf   : > { %v907_v36 = vsel %vm906_vm5, %v901_v35, %v903_v32  ;;  %v4865_v35 = vld [vmem:[%s5281_s3] sm:$0xf] }
  0xe0   : > { %4071 = vmatmul.mubr.msk.f32.vlgmr.msra.gmra.mrb[0].mxu1 %vm421_vm3, %v726_v28  ;;  %v1075_v37 = vpop.permute.xlu1 %1074 }
  0xe1   : > { %4074 = vmatpush3.msk.msra.mxu1 %vm424_vm1, %v905_v31  ;;  %4075 = vmatprep.mubr.msk.f32.mxu1 %vm4444_vm0, %v4443_v0 }
  0xe2   : > { %3939 = vmatmul.mubr.msk.f32.vlgmr.msra.gmra.mrb[0].mxu0 %vm421_vm3, %v726_v28  ;;  %v1073_v38 = vpop.permute.xlu0 %1072  ;;  %4078 = vmatprep.subr.mxu1 %v4443_v0 }
  0xe3   : > { %3943 = vmatpush1.msk.msra.mxu0 %vm424_vm1, %v907_v36  ;;  %v1078_v39 = vsel %vm5262_vm6, %v1073_v38, %v1075_v37  ;;  %981 = vmatprep.mubr.f32.mxu0 %v4443_v0 }
  0xe4   : > { %3947 = vmatprep.subr.msk.mxu0 %vm424_vm1, %v1078_v39  ;;  %v1066_v40 = vpop.permute.xlu1 %1065 }
  0xe6   : > { %v1071_v41 = vpop.permute.xlu0 %1070 }
  0xe7   : > { %v1077_v42 = vsel %vm5262_vm6, %v1071_v41, %v1073_v38 }
  0xe8   : > { %4076 = vmatmul.mubr.msk.f32.vlgmr.msra.gmra.mrb[0].mxu1 %vm421_vm3, %v896_v34  ;;  %v1245_v43 = vpop.permute.xlu1 %1244 }
  0xe9   : > { %4079 = vmatpush3.msk.msra.mxu1 %vm424_vm1, %v1075_v37  ;;  %4080 = vmatprep.mubr.msk.f32.mxu1 %vm4444_vm0, %v4443_v0 }
  0xea   : > { %3944 = vmatmul.mubr.msk.f32.vlgmr.msra.gmra.mrb[0].mxu0 %vm421_vm3, %v896_v34  ;;  %v1243_v44 = vpop.permute.xlu0 %1242  ;;  %4083 = vmatprep.subr.mxu1 %v4443_v0 }
  0xeb   : > { %3948 = vmatpush1.msk.msra.mxu0 %vm424_vm1, %v1077_v42  ;;  %v1248_v45 = vsel %vm1246_vm7, %v1243_v44, %v1245_v43  ;;  %1151 = vmatprep.mubr.f32.mxu0 %v4443_v0 }
  0xec   : > { %3952 = vmatprep.subr.msk.mxu0 %vm424_vm1, %v1248_v45  ;;  %v1236_v46 = vpop.permute.xlu1 %1235 }
  0xee   : > { %v1241_v47 = vpop.permute.xlu0 %1240 }
  0xef   : > { %v1247_v48 = vsel %vm1246_vm7, %v1241_v47, %v1243_v44 }
  0xf0   : > { %4081 = vmatmul.mubr.msk.f32.vlgmr.msra.gmra.mrb[0].mxu1 %vm421_vm3, %v1066_v40  ;;  %v1415_v49 = vpop.permute.xlu1 %1414 }
  0xf1   : > { %4084 = vmatpush3.msk.msra.mxu1 %vm424_vm1, %v1245_v43  ;;  %4085 = vmatprep.mubr.msk.f32.mxu1 %vm4444_vm0, %v4443_v0 }
  0xf2   : > { %3949 = vmatmul.mubr.msk.f32.vlgmr.msra.gmra.mrb[0].mxu0 %vm421_vm3, %v1066_v40  ;;  %v1413_v50 = vpop.permute.xlu0 %1412  ;;  %4088 = vmatprep.subr.mxu1 %v4443_v0 }
  0xf3   : > { %3953 = vmatpush1.msk.msra.mxu0 %vm424_vm1, %v1247_v48  ;;  %v1418_v51 = vsel %vm5261_vm8, %v1413_v50, %v1415_v49  ;;  %1321 = vmatprep.mubr.f32.mxu0 %v4443_v0 }
  0xf4   : > { %3957 = vmatprep.subr.msk.mxu0 %vm424_vm1, %v1418_v51  ;;  %v1406_v52 = vpop.permute.xlu1 %1405 }
  0xf6   : > { %v1411_v53 = vpop.permute.xlu0 %1410 }
  0xf7   : > { %v1417_v54 = vsel %vm5261_vm8, %v1411_v53, %v1413_v50 }
  0xf8   : > { %4086 = vmatmul.mubr.msk.f32.vlgmr.msra.gmra.mrb[0].mxu1 %vm421_vm3, %v1236_v46  ;;  %v1585_v55 = vpop.permute.xlu1 %1584 }
  0xf9   : > { %4089 = vmatpush3.msk.msra.mxu1 %vm424_vm1, %v1415_v49  ;;  %4090 = vmatprep.mubr.msk.f32.mxu1 %vm4444_vm0, %v4443_v0 }
  0xfa   : > { %3954 = vmatmul.mubr.msk.f32.vlgmr.msra.gmra.mrb[0].mxu0 %vm421_vm3, %v1236_v46  ;;  %v1583_v56 = vpop.permute.xlu0 %1582  ;;  %4093 = vmatprep.subr.mxu1 %v4443_v0 }
  0xfb   : > { %3958 = vmatpush1.msk.msra.mxu0 %vm424_vm1, %v1417_v54  ;;  %v1588_v57 = vsel %vm5260_vm9, %v1583_v56, %v1585_v55  ;;  %1491 = vmatprep.mubr.f32.mxu0 %v4443_v0 }
  0xfc   : > { %3962 = vmatprep.subr.msk.mxu0 %vm424_vm1, %v1588_v57  ;;  %v1576_v58 = vpop.permute.xlu1 %1575 }
  0xfe   : > { %v1581_v59 = vpop.permute.xlu0 %1580 }
  0xff   : > { %v1587_v60 = vsel %vm5260_vm9, %v1581_v59, %v1583_v56 }
 0x100   : > { %4091 = vmatmul.mubr.msk.f32.vlgmr.msra.gmra.mrb[0].mxu1 %vm421_vm3, %v1406_v52  ;;  %v1755_v61 = vpop.permute.xlu1 %1754 }
 0x101   : > { %4094 = vmatpush3.msk.msra.mxu1 %vm424_vm1, %v1585_v55  ;;  %4095 = vmatprep.mubr.msk.f32.mxu1 %vm4444_vm0, %v4443_v0 }
 0x102   : > { %3959 = vmatmul.mubr.msk.f32.vlgmr.msra.gmra.mrb[0].mxu0 %vm421_vm3, %v1406_v52  ;;  %v1753_v62 = vpop.permute.xlu0 %1752  ;;  %4098 = vmatprep.subr.mxu1 %v4443_v0 }
 0x103   : > { %3963 = vmatpush1.msk.msra.mxu0 %vm424_vm1, %v1587_v60  ;;  %v1758_v63 = vsel %vm5259_vm10, %v1753_v62, %v1755_v61  ;;  %1661 = vmatprep.mubr.f32.mxu0 %v4443_v0 }
 0x104   : > { %3967 = vmatprep.subr.msk.mxu0 %vm424_vm1, %v1758_v63  ;;  %v1746_v3 = vpop.permute.xlu1 %1745 }
 0x106   : > { %v1751_v1 = vpop.permute.xlu0 %1750 }
 0x107   : > { %v1757_v2 = vsel %vm5259_vm10, %v1751_v1, %v1753_v62 }
 0x108   : > { %4096 = vmatmul.mubr.msk.f32.vlgmr.msra.gmra.mrb[0].mxu1 %vm421_vm3, %v1576_v58 }
 0x109   : > { %4099 = vmatpush3.msk.msra.mxu1 %vm424_vm1, %v1755_v61  ;;  %4100 = vmatprep.mubr.msk.f32.mxu1 %vm4444_vm0, %v4443_v0 }
 0x10a   : > { %3964 = vmatmul.mubr.msk.f32.vlgmr.msra.gmra.mrb[0].mxu0 %vm421_vm3, %v1576_v58  ;;  %4103 = vmatprep.subr.mxu1 %v4443_v0 }
 0x10b   : > { %3968 = vmatpush1.msk.msra.mxu0 %vm424_vm1, %v1757_v2  ;;  %1831 = vmatprep.mubr.f32.mxu0 %v4443_v0 }
 0x110   : > { %4101 = vmatmul.mubr.msk.f32.vlgmr.msra.gmra.mrb[0].mxu1 %vm421_vm3, %v1746_v3 }
 0x111   : > { %4105 = vmatprep.mubr.msk.f32.mxu1 %vm4444_vm0, %v4443_v0 }
 0x112   : > { %3969 = vmatmul.mubr.msk.f32.vlgmr.msra.gmra.mrb[0].mxu0 %vm421_vm3, %v1746_v3 }
 0x113   : > { %2251 = vmatprep.mubr.f32.mxu0 %v4443_v0 }
 0x1e3   : > { %v4846_v13 = vpop.f32.mrb[0].mxu1 }
 0x1e4   : > { %v4102_v15 = vpop.f32.mrb[1].mxu1  ;;  %v1935_v16 = vmul.f32 %v1929_v11, %v4846_v13  ;;  %v4460_v11 = vmov 0  }
 0x1e5   : > { %v4850_v17 = vpop.f32.mrb[0].mxu0  ;;  %4313 = vset.pattern.permute.xlu0 %v4460_v11  ;;  %4314 = vset.pattern.permute.xlu1 %v4460_v11 }
 0x1e6   : > { %v1933_v18 = vmul.f32 %v1921_v12, %v4850_v17  ;;  %v4853_v19 = vpop.f32.mrb[1].mxu0  ;;  %v1946_v23 = vmul.f32 %v1935_v16, %v1935_v16  ;;  %v1940_v28 = vsel %vm5258_vm14, %v1935_v16, 0.0 }
 0x1e7   : > { %v1934_v20 = vmul.f32 %v1925_v14, %v4853_v19 }
 0x1e8   : > { %v1936_v21 = vsel %vm424_vm1, %v1933_v18, 0.0  ;;  %v1944_v22 = vmul.f32 %v1933_v18, %v1933_v18  ;;  %v1950_v32 = vsel %vm5258_vm14, %v1946_v23, 0.0  ;;  %vm2061_vm14 = vcmask 404480  }
 0x1e9   : > { %v1937_v24 = vsel %vm424_vm1, %v1934_v20, 0.0  ;;  %v1945_v25 = vmul.f32 %v1934_v20, %v1934_v20 }
 0x1ea   : > { %v1938_v26 = vadd.f32 %v1937_v24, %v1936_v21  ;;  %v1947_v27 = vsel %vm424_vm1, %v1944_v22, 0.0 }
 0x1eb   : > { %v1948_v29 = vsel %vm424_vm1, %v1945_v25, 0.0 }
 0x1ec   : > { %v1941_v30 = vadd.f32 %v1940_v28, %v1938_v26  ;;  %v1949_v31 = vadd.f32 %v1948_v29, %v1947_v27 }
 0x1ee   : > { %1942 = vadd.xlane.f32.xlu0 %v1941_v30  ;;  %v1951_v33 = vadd.f32 %v1950_v32, %v1949_v31 }
 0x1f2   : > { %1952 = vadd.xlane.f32.xlu0 %v1951_v33 }
 0x27b   : > { %v1943_v34 = vpop.xlane.xlu0 %1942 }
 0x27c   : > { %v1954_v36 = vmul.f32 0.00390625, %v1943_v34 }
 0x27e   : > { %v1955_v37 = vmul.f32 256.0, %v1954_v36  ;;  %v4868_v38 = vadd.f32 %v1954_v36, %v4865_v35 }
 0x27f   : > { %v1953_v41 = vpop.xlane.xlu0 %1952 }
 0x280   : > { %v1956_v39 = vmul.f32 %v1955_v37, %v1954_v36  ;;  %v1964_v40 = vsel %vm5257_vm15, %v4868_v38, 0.0 }
 0x281   : > { %1965 = vadd.xlane.f32.xlu1 %v1964_v40 }
 0x282   : > { %v1957_v42 = vsub.f32 %v1953_v41, %v1956_v39 }
 0x284   : > { %v1958_v43 = vmax.f32 %v1957_v42, 0.0 }
 0x286   : > { %v1977_v44 = vsel %vm5257_vm15, %v1958_v43, 0.0  ;;  %v1960_v15 = vmul.f32 0.003921569, %v1958_v43 }
 0x287   : > { %1978 = vadd.xlane.f32.xlu0 %v1977_v44 }
 0x288   : > { %v1961_v16 = vadd.f32 1e-06, %v1960_v15 }
 0x30e   : > { %v1966_v45 = vpop.xlane.xlu1 %1965 }
 0x30f   : > { %v1967_v46 = vrot.slane %v1966_v45, 4 }
 0x311   : > { %v1968_v47 = vadd.f32 %v1967_v46, %v1966_v45 }
 0x313   : > { %v1969_v48 = vrot.slane %v1968_v47, 2 }
 0x314   : > { %v1979_v49 = vpop.xlane.xlu0 %1978 }
 0x315   : > { %v1980_v50 = vrot.slane %v1979_v49, 4  ;;  %v1970_v51 = vadd.f32 %v1969_v48, %v1968_v47 }
 0x317   : > { %v1981_v52 = vadd.f32 %v1980_v50, %v1979_v49  ;;  %v1971_v53 = vrot.slane %v1970_v51, 1 }
 0x319   : > { %v1982_v54 = vrot.slane %v1981_v52, 2  ;;  %v1972_v55 = vadd.f32 %v1971_v53, %v1970_v51 }
 0x31b   : > { %4214 = vpush %v1972_v55  ;;  %v1983_v56 = vadd.f32 %v1982_v54, %v1981_v52 }
 0x31d   : > { %v1984_v57 = vrot.slane %v1983_v56, 1 }
 0x31f   : > { %v1985_v58 = vadd.f32 %v1984_v57, %v1983_v56 }
 0x321   : > { %4216 = vpush %v1985_v58 }
 0x34c   : > { %s4873_s16 = spop %4214 }
 0x34d   : > { %s5256_s26 = smul.f32 0.25, %s4873_s16 }
 0x34f   : > { %v1987_v59 = vstv %s5256_s26  ;;  %s398_s26 = smax.f32 %s4461_s27, %s3925_s25  ;;  %s5291_s25 = smov 120  }
 0x350   : > { %v1988_v60 = vsub.f32 %v4868_v38, %v1987_v59 }
 0x352   : > { %v1989_v61 = vmul.f32 %v1988_v60, %v1988_v60  ;;  %s4217_s22 = spop %4216 }
 0x354   : > { %v1990_v62 = vsel %vm5257_vm15, %v1989_v61, 0.0  ;;  %vm4907_vm15 = vmor %vm2058_vm12, %vm2057_vm11  ;;  %vm2066_vm11 = vcmp.eq.s32.totalorder %v4833_v4, 17  ;;  %vm2065_vm12 = vcmp.eq.s32.totalorder %v4833_v4, 0 }
 0x355   : > { %1991 = vadd.xlane.f32.xlu1 %v1990_v62  ;;  %v2067_v53 = vsel %vm2066_vm11, 1, %v4460_v11  ;;  %v2101_v54 = vsel %vm2065_vm12, 1, %v4460_v11  ;;  %vm2092_vm11 = vcmask 916480  }
 0x356   : > { %v2079_v55 = vrot.slane %v2067_v53, %v4837_v7  ;;  %v2113_v56 = vrot.slane %v2101_v54, %v4837_v7 }
 0x358   : > { %vm2082_vm10 = vcmp.eq.s32.totalorder %v2079_v55, 1  ;;  %vm2116_vm9 = vcmp.eq.s32.totalorder %v2113_v56, 1 }
 0x3e2   : > { %v1992_v63 = vpop.xlane.xlu1 %1991 }
 0x3e3   : > { %v1993_v1 = vrot.slane %v1992_v63, 4 }
 0x3e5   : > { %v1994_v2 = vadd.f32 %v1993_v1, %v1992_v63  ;;  %v2071_v63 = vrot.slane %v2067_v53, %v4840_v9  ;;  %v2075_v1 = vrot.slane %v2067_v53, %v4842_v10 }
 0x3e7   : > { %v1995_v3 = vrot.slane %v1994_v2, 2  ;;  %vm2080_vm12 = vcmp.eq.s32.totalorder %v2071_v63, 1  ;;  %vm2081_vm8 = vcmp.eq.s32.totalorder %v2075_v1, 1 }
 0x3e9   : > { %v1996_v5 = vadd.f32 %v1995_v3, %v1994_v2  ;;  %v2105_v2 = vrot.slane %v2101_v54, %v4840_v9  ;;  %v2109_v3 = vrot.slane %v2101_v54, %v4842_v10 }
 0x3eb   : > { %v1997_v6 = vrot.slane %v1996_v5, 1  ;;  %vm2114_vm6 = vcmp.eq.s32.totalorder %v2105_v2, 1 }
 0x3ed   : > { %v1998_v8 = vadd.f32 %v1997_v6, %v1996_v5 }
 0x3ef   : > { %4218 = vpush %v1998_v8 }
 0x420   : > { %s4219_s24 = spop %4218 }
 0x421   : > { %s2000_s29 = smul.f32 256.0, %s4219_s24  ;;  %s399_s24 = smin.f32 %s4462_s0, %s398_s26 }
 0x422   : > { %v2007_v18 = vstv %s399_s24 }
 0x423   : > { %s2001_s17 = sadd.f32 %s4217_s22, %s2000_s29  ;;  %v2014_v21 = vmul.f32 %v2007_v18, %v4868_v38 }
 0x424   : > { %s2009_s29 = ssub.f32 1.0, %s399_s24  ;;  %s5288_s24 = smov 127  }
 0x425   : > { %s2002_s14 = smul.f32 0.0009775171, %s2001_s17  ;;  %s3922_s17 = sshll.u32 %s4626_s23, 2 }
 0x426   : > { %s387_s2 = scalar_lea.vmem %s5225_s6, %s3922_s17  ;;  %s391_s26 = scalar_lea.vmem %s5226_s7, %s3922_s17 }
 0x427   : > { %s2003_s28 = sadd.f32 1e-06, %s2002_s14  ;;  %v4891_v23 = vld [vmem:[%s387_s2] sm:$0xf]  ;;  %s5285_s2 = smov 112  }
 0x428   : > { %v4897_v30 = vld [vmem:[%s391_s26] sm:$0xf]  ;;  %s5292_s23 = smov 110   ;;  %s5297_s26 = smov 100  }
 0x429   : > { %v2004_v12 = vstv %s2003_s28  ;;  %s5282_s28 = smul.f32 0.25, %s4873_s16  ;;  %s5287_s16 = smov 92  }
 0x42a   : > { %4318 = vrsqrt.f32 %v2004_v12 }
 0x42b   : > { %4320 = vrsqrt.f32 %v1961_v16  ;;  %s2016_s14 = smul.f32 %s2009_s29, %s5282_s28  ;;  %s5289_s28 = smov 124  }
 0x434   : > { %v4319_v14 = vpop.eup %4318 }
 0x435   : > { %4220 = vpush %v4319_v14  ;;  %v4321_v20 = vpop.eup %4320 }
 0x436   : > { %v2008_v22 = vmul.f32 %v4321_v20, %v2007_v18  ;;  %v2015_v25 = vmul.f32 %v4321_v20, %v2014_v21 }
 0x466   : > { %s4221_s3 = spop %4220 }
 0x467   : > { %s2010_s8 = smul.f32 %s4221_s3, %s2009_s29 }
 0x468   : > { %s2017_s21 = smul.f32 %s4221_s3, %s2016_s14  ;;  %s5286_s3 = smov 108  }
 0x469   : > { %v2011_v24 = vstv %s2010_s8  ;;  %s4464_s8 = smov 36   ;;  %s5290_s14 = smov 126  }
 0x46a   : > { %v2012_v26 = vadd.f32 %v2011_v24, %v2008_v22  ;;  %v2018_v27 = vstv %s2017_s21  ;;  %s5295_s21 = smov 104  }
 0x46b   : > { %v2019_v28 = vadd.f32 %v2018_v27, %v2015_v25 }
 0x46c   : > { %v2013_v29 = vmul.f32 %v2012_v26, %v4891_v23 }
 0x46d   : > { %v2020_v31 = vmul.f32 %v2019_v28, %v4891_v23 }
 0x46e   : > { %2026 = vperm.xlu0 %4313, %v2013_v29   ;;  %v2022_v32 = vmul.f32 %v2013_v29, %v4865_v35 }
 0x46f   : > { %v2021_v33 = vsub.f32 %v4897_v30, %v2020_v31 }
 0x471   : > { %v2023_v34 = vadd.f32 %v2022_v32, %v2021_v33 }
 0x473   : > { %2034 = vperm.xlu1 %4314, %v2023_v34  }
 0x4ed   : > { %v2027_v36 = vpop.permute.xlu0 %2026 }
 0x4ee   : > { %v2029_v37 = vmul.f32 %v2027_v36, %v4850_v17  ;;  %v2030_v38 = vmul.f32 %v2027_v36, %v4853_v19  ;;  %v2031_v42 = vmul.f32 %v2027_v36, %v4846_v13  ;;  %v3322_v19 = vld [vmem:[%s5223_s4] sm:$0xf] }
 0x4f2   : > { %v2035_v39 = vpop.permute.xlu1 %2034 }
 0x4f3   : > { %v2037_v40 = vadd.f32 %v2035_v39, %v2029_v37  ;;  %v2038_v41 = vadd.f32 %v2035_v39, %v2030_v38  ;;  %v2039_v45 = vadd.f32 %v2035_v39, %v2031_v42  ;;  %v4955_v37 = vld [vmem:[%s5223_s4] sm:$0xf] }
 0x4f4   : > { %v2477_v39 = vld [vmem:[%s5223_s4] sm:$0xf] }
 0x4f5   : > { %v2040_v43 = vmax.f32 %v2037_v40, 0.0  ;;  %v2041_v44 = vmax.f32 %v2038_v41, 0.0  ;;  %v2042_v35 = vmax.f32 %v2039_v45, 0.0  ;;  %v2646_v41 = vld [vmem:[%s5223_s4] sm:$0xf] }
 0x4f6   : > { %v2984_v45 = vld [vmem:[%s5223_s4] sm:$0xf] }
 0x4f7   : > { %v2046_v46 = vcombine.low %v2040_v43, %v2041_v44 }
 0x4f9   : > { %2047 = vrot.lane.b32.xlu1 %v2046_v46, %s4463_s1 }
 0x4fd   : > { %2049 = vrot.lane.b32.xlu1 %v2042_v35, %s4463_s1 }
 0x56b   : > { %v2048_v17 = vpop.permute.xlu1 %2047 }
 0x56c   : > { %v2051_v47 = vrot.slane %v2048_v17, 4 }
 0x56e   : > { %v2053_v13 = vsel %vm2052_vm13, %v2051_v47, %v2048_v17 }
 0x56f   : > { %2060 = vst.msk [vmem:[#allocation2] sm:$0xff] %vm4907_vm15, %v2053_v13  ;;  %v2050_v48 = vpop.permute.xlu1 %2049  ;;  %v3491_v13 = vld [vmem:[%s5223_s4] sm:$0xf] }
 0x570   : > { %v2054_v49 = vsel %vm2052_vm13, %v2051_v47, %v2050_v48 }
 0x571   : > { %2062 = vst.msk [vmem:[#allocation2 + $0x8] sm:$0xf] %vm2061_vm14, %v2054_v49 }
 0x576   : > { %v2063_v50 = vld [vmem:[#allocation2] sm:$0xff] }
 0x577   : > { %2086 = vrot.lane.b32.xlu1 %v2063_v50, %s5285_s2  ;;  %v2085_v52 = vcombine.high %v2063_v50, %v2063_v50 }
 0x578   : > { %v2064_v51 = vld [vmem:[#allocation2 + $0x8] sm:$0xf] }
 0x579   : > { %2121 = vrot.lane.b32.xlu0 %v2064_v51, %s5286_s3 }
 0x57b   : > { %2090 = vrot.lane.b32.xlu1 %v2064_v51, %s5285_s2 }
 0x57f   : > { %2117 = vrot.lane.b32.xlu1 %v2063_v50, %s5286_s3 }
 0x583   : > { %2088 = vrot.lane.b32.xlu1 %v2085_v52, %s5285_s2 }
 0x587   : > { %2119 = vrot.lane.b32.xlu1 %v2085_v52, %s5286_s3 }
 0x5e9   : > { %v2087_v57 = vpop.permute.xlu1 %2086 }
 0x5eb   : > { %v2122_v59 = vpop.permute.xlu0 %2121 }
 0x5ed   : > { %v2091_v58 = vpop.permute.xlu1 %2090 }
 0x5ee   : > { %v2100_v60 = vsel %vm2082_vm10, %v2091_v58, %v2042_v35  ;;  %vm2115_vm10 = vcmp.eq.s32.totalorder %v2109_v3, 1  ;;  %v3153_v35 = vld [vmem:[%s5223_s4] sm:$0xf] }
 0x5ef   : > { %v2130_v61 = vsel %vm2116_vm9, %v2122_v59, %v2100_v60  ;;  %vm2160_vm9 = vcmask 568864  }
 0x5f0   : > { %2137 = vrot.lane.b32.xlu0 %v2130_v61, %s4463_s1 }
 0x5f1   : > { %v2118_v62 = vpop.permute.xlu1 %2117 }
 0x5f5   : > { %v2089_v5 = vpop.permute.xlu1 %2088 }
 0x5f6   : > { %v2093_v6 = vsel %vm2092_vm11, %v2087_v57, %v2089_v5  ;;  %v2094_v8 = vsel %vm2092_vm11, %v2089_v5, %v2091_v58 }
 0x5f7   : > { %v2098_v12 = vsel %vm2080_vm12, %v2093_v6, %v2040_v43  ;;  %v2099_v14 = vsel %vm2081_vm8, %v2094_v8, %v2041_v44  ;;  %vm2151_vm8 = vcmask 142336   ;;  %v2815_v43 = vld [vmem:[%s5223_s4] sm:$0xf]  ;;  %vm3660_vm12 = vcmp.lt.s32.totalorder %v4833_v4, 16 }
 0x5f9   : > { %v2120_v11 = vpop.permute.xlu1 %2119 }
 0x5fa   : > { %v2123_v15 = vsel %vm1246_vm7, %v2118_v62, %v2120_v11  ;;  %v2124_v16 = vsel %vm1246_vm7, %v2120_v11, %v2122_v59 }
 0x5fb   : > { %v2128_v18 = vsel %vm2114_vm6, %v2123_v15, %v2098_v12  ;;  %v2129_v20 = vsel %vm2115_vm10, %v2124_v16, %v2099_v14  ;;  %vm2158_vm6 = vcmask 552336   ;;  %vm5310_vm10 = vcmask 3072  }
 0x5fc   : > { %v2134_v21 = vcombine.low %v2128_v18, %v2129_v20 }
 0x5fe   : > { %2135 = vrot.lane.b32.xlu1 %v2134_v21, %s4463_s1  ;;  %s5298_s1 = smov 90  }
 0x662   : > { %v2138_v25 = vpop.permute.xlu0 %2137 }
 0x670   : > { %v2136_v22 = vpop.permute.xlu1 %2135 }
 0x671   : > { %v2139_v24 = vrot.slane %v2136_v22, 4 }
 0x673   : > { %v2140_v26 = vsel %vm2052_vm13, %v2139_v24, %v2136_v22  ;;  %v2141_v27 = vsel %vm2052_vm13, %v2139_v24, %v2138_v25  ;;  %vm5306_vm13 = vcmask 736256  }
 0x674   : > { %2144 = vst.msk [vmem:[#allocation2] sm:$0xff] %vm4907_vm15, %v2140_v26  ;;  %vm5307_vm11 = vmmov %vm5306_vm13 }
 0x675   : > { %2145 = vst.msk [vmem:[#allocation2 + $0x8] sm:$0xf] %vm2061_vm14, %v2141_v27  ;;  %vm5304_vm14 = vcmask 744448  }
 0x676   : > { %vm5305_vm15 = vmmov %vm5304_vm14 }
 0x67b   : > { %v2146_v29 = vld [vmem:[#allocation2] sm:$0xf] }
 0x67c   : > { %v2153_v28 = vld [vmem:[#allocation2 + $0x8] sm:$0xf]  ;;  %2148 = vrot.lane.b32.xlu1 %v2146_v29, %s5287_s16 }
 0x67d   : > { %2155 = vrot.lane.b32.xlu0 %v2153_v28, %s4464_s8  ;;  %s5293_s8 = smov 116  }
 0x6ee   : > { %v2149_v32 = vpop.permute.xlu1 %2148 }
 0x6ef   : > { %v2156_v31 = vpop.permute.xlu0 %2155  ;;  %2152 = vst.msk [vmem:[#allocation2] sm:$0xf] %vm2151_vm8, %v2149_v32 }
 0x6f0   : > { %2159 = vst.msk [vmem:[#allocation2 + $0x8] sm:$0xf] %vm2158_vm6, %v2156_v31 }
 0x6f1   : > { %2161 = vst.msk [vmem:[#allocation2 + $0x8] sm:$0xf] %vm2160_vm9, %v4443_v0 }
 0x6f6   : > { %v4943_v33 = vld [vmem:[#allocation2] sm:$0xff] }
 0x6f7   : > { %v4947_v36 = vcombine.high %v4943_v33, %v4943_v33 }
 0x6f8   : > { %v2164_v34 = vld [vmem:[#allocation2 + $0x8] sm:$0xf] }
 0x6f9   : > { %2175 = vrot.lane.b32.xlu0 %v2164_v34, %s5288_s24  ;;  %2173 = vrot.lane.b32.xlu1 %v4947_v36, %s5288_s24  ;;  %v2479_v38 = vld [vmem:[#allocation2 + $0x8] sm:$0xf] }
 0x6fa   : > { %v2648_v40 = vld [vmem:[#allocation2 + $0x8] sm:$0xf] }
 0x6fb   : > { %v2817_v42 = vld [vmem:[#allocation2 + $0x8] sm:$0xf] }
 0x6fc   : > { %v2986_v44 = vld [vmem:[#allocation2 + $0x8] sm:$0xf] }
 0x6fd   : > { %2166 = vrot.lane.b32.xlu0 %v4955_v37, %s5289_s28  ;;  %2171 = vrot.lane.b32.xlu1 %v4943_v33, %s5288_s24  ;;  %s5294_s24 = smov 109   ;;  %v3155_v46 = vld [vmem:[#allocation2 + $0x8] sm:$0xf] }
 0x6fe   : > { %v3324_v17 = vld [vmem:[#allocation2 + $0x8] sm:$0xf] }
 0x6ff   : > { %v3493_v47 = vld [vmem:[#allocation2 + $0x8] sm:$0xf] }
 0x701   : > { %2490 = vrot.lane.b32.xlu0 %v2479_v38, %s5290_s14  ;;  %2488 = vrot.lane.b32.xlu1 %v4947_v36, %s5290_s14 }
 0x705   : > { %2481 = vrot.lane.b32.xlu0 %v2477_v39, %s5291_s25  ;;  %2486 = vrot.lane.b32.xlu1 %v4943_v33, %s5290_s14  ;;  %s5296_s25 = smov 91  }
 0x709   : > { %2659 = vrot.lane.b32.xlu0 %v2648_v40, %s5292_s23  ;;  %2657 = vrot.lane.b32.xlu1 %v4947_v36, %s5292_s23 }
 0x70d   : > { %2650 = vrot.lane.b32.xlu0 %v2646_v41, %s5293_s8  ;;  %2655 = vrot.lane.b32.xlu1 %v4943_v33, %s5292_s23 }
 0x711   : > { %2828 = vrot.lane.b32.xlu0 %v2817_v42, %s5294_s24  ;;  %2826 = vrot.lane.b32.xlu1 %v4947_v36, %s5294_s24 }
 0x715   : > { %2819 = vrot.lane.b32.xlu0 %v2815_v43, %s5285_s2  ;;  %2824 = vrot.lane.b32.xlu1 %v4943_v33, %s5294_s24  ;;  %s5299_s24 = smov 96   ;;  %v4018_v43 = vsel %vm3660_vm12, 1.0, %v4443_v0 }
 0x719   : > { %2997 = vrot.lane.b32.xlu0 %v2986_v44, %s5286_s3  ;;  %2995 = vrot.lane.b32.xlu1 %v4947_v36, %s5286_s3  ;;  %v3676_v44 = vrot.slane %v4018_v43, %v4837_v7 }
 0x71d   : > { %2988 = vrot.lane.b32.xlu0 %v2984_v45, %s5286_s3  ;;  %2993 = vrot.lane.b32.xlu1 %v4943_v33, %s5286_s3 }
 0x721   : > { %3166 = vrot.lane.b32.xlu0 %v3155_v46, %s5287_s16  ;;  %3164 = vrot.lane.b32.xlu1 %v4947_v36, %s5287_s16  ;;  %v3668_v46 = vrot.slane %v4018_v43, %v4840_v9 }
 0x725   : > { %3157 = vrot.lane.b32.xlu0 %v3153_v35, %s5295_s21  ;;  %3162 = vrot.lane.b32.xlu1 %v4943_v33, %s5287_s16 }
 0x729   : > { %3335 = vrot.lane.b32.xlu0 %v3324_v17, %s5296_s25  ;;  %3333 = vrot.lane.b32.xlu1 %v4947_v36, %s5296_s25  ;;  %v3672_v17 = vrot.slane %v4018_v43, %v4842_v10 }
 0x72d   : > { %3326 = vrot.lane.b32.xlu0 %v3322_v19, %s5297_s26  ;;  %3331 = vrot.lane.b32.xlu1 %v4943_v33, %s5296_s25  ;;  %s3924_s26 = sld [smem:[#allocation7 + $0x1]] }
 0x731   : > { %3504 = vrot.lane.b32.xlu0 %v3493_v47, %s5298_s1  ;;  %3502 = vrot.lane.b32.xlu1 %v4947_v36, %s5298_s1 }
 0x735   : > { %3495 = vrot.lane.b32.xlu0 %v3491_v13, %s5299_s24  ;;  %3500 = vrot.lane.b32.xlu1 %v4943_v33, %s5298_s1  ;;  %s3926_s1 = sadd.f32 -0.1, %s3924_s26 }
 0x737   : > { %s401_s16 = smax.f32 %s4461_s27, %s3926_s1  ;;  %s4465_s1 = smov [#allocation8]  }
 0x738   : > { %s402_s8 = smin.f32 %s4462_s0, %s401_s16  ;;  %s376_s0 = sand.u32 1, %s4431_s10  }
 0x739   : > { %s3754_s24 = ssub.f32 1.0, %s402_s8  ;;  %s4212_s27 = smul.u32 12, %s376_s0 }
 0x73a   : > { %s4373_s16 = sshll.u32 %s4465_s1, 4  ;;  %s4374_s16 = int_to_ptr.vmem [resolvable:$false] %s4373_s16 }
 0x76b   : > { %v2176_v48 = vpop.permute.xlu0 %2175  ;;  %v2174_v49 = vpop.permute.xlu1 %2173 }
 0x76c   : > { %4104 = vmatpush3.msk.msra.mxu1 %vm424_vm1, %v2176_v48  ;;  %v2178_v50 = vsel %vm418_vm2, %v2174_v49, %v2176_v48 }
 0x76d   : > { %4108 = vmatprep.subr.mxu1 %v4443_v0  ;;  %3973 = vmatprep.subr.msk.mxu0 %vm424_vm1, %v2178_v50 }
 0x76f   : > { %v2167_v51 = vpop.permute.xlu0 %2166  ;;  %v2172_v52 = vpop.permute.xlu1 %2171 }
 0x770   : > { %4106 = vmatmul.mubr.msk.f32.vlgmr.msra.gmra.mrb[2].mxu1 %vm421_vm3, %v2167_v51  ;;  %v2177_v53 = vsel %vm418_vm2, %v2172_v52, %v2174_v49  ;;  %vm5300_vm2 = vcmask 891904  }
 0x771   : > { %4109 = vmatpush3.msk.msra.mxu1 %vm424_vm1, %v2164_v34  ;;  %4110 = vmatprep.mubr.msk.f32.mxu1 %vm4444_vm0, %v4443_v0 }
 0x772   : > { %3974 = vmatpush1.msk.msra.mxu0 %vm424_vm1, %v2177_v53  ;;  %4113 = vmatprep.subr.mxu1 %v4443_v0 }
 0x773   : > { %3975 = vmatmul.mubr.msk.f32.vlgmr.msra.gmra.mrb[2].mxu0 %vm421_vm3, %v2167_v51  ;;  %3978 = vmatprep.subr.msk.mxu0 %vm424_vm1, %v4947_v36  ;;  %v2491_v54 = vpop.permute.xlu0 %2490  ;;  %v2489_v55 = vpop.permute.xlu1 %2488 }
 0x774   : > { %3979 = vmatpush1.msk.msra.mxu0 %vm424_vm1, %v4943_v33  ;;  %2400 = vmatprep.mubr.f32.mxu0 %v4443_v0  ;;  %v2493_v56 = vsel %vm736_vm4, %v2489_v55, %v2491_v54 }
 0x775   : > { %3983 = vmatprep.subr.msk.mxu0 %vm424_vm1, %v2493_v56 }
 0x777   : > { %v2482_v57 = vpop.permute.xlu0 %2481  ;;  %v2487_v58 = vpop.permute.xlu1 %2486 }
 0x778   : > { %4111 = vmatmul.mubr.msk.f32.vlgmr.msra.gmra.mrb[2].mxu1 %vm421_vm3, %v4955_v37  ;;  %v2492_v59 = vsel %vm736_vm4, %v2487_v58, %v2489_v55  ;;  %vm5301_vm4 = vmmov %vm5300_vm2 }
 0x779   : > { %4114 = vmatpush3.msk.msra.mxu1 %vm424_vm1, %v2491_v54  ;;  %4115 = vmatprep.mubr.msk.f32.mxu1 %vm4444_vm0, %v4443_v0 }
 0x77a   : > { %4118 = vmatprep.subr.mxu1 %v4443_v0 }
 0x77b   : > { %3980 = vmatmul.mubr.msk.f32.vlgmr.msra.gmra.mrb[2].mxu0 %vm421_vm3, %v4955_v37  ;;  %v2660_v60 = vpop.permute.xlu0 %2659  ;;  %v2658_v61 = vpop.permute.xlu1 %2657 }
 0x77c   : > { %3984 = vmatpush1.msk.msra.mxu0 %vm424_vm1, %v2492_v59  ;;  %2566 = vmatprep.mubr.f32.mxu0 %v4443_v0  ;;  %v2662_v62 = vsel %vm906_vm5, %v2658_v61, %v2660_v60  ;;  %v5144_v59 = vld [vmem:[%s5224_s5] sm:$0xf] }
 0x77d   : > { %3988 = vmatprep.subr.msk.mxu0 %vm424_vm1, %v2662_v62 }
 0x77f   : > { %v2651_v63 = vpop.permute.xlu0 %2650  ;;  %v2656_v1 = vpop.permute.xlu1 %2655 }
 0x780   : > { %4116 = vmatmul.mubr.msk.f32.vlgmr.msra.gmra.mrb[2].mxu1 %vm421_vm3, %v2482_v57  ;;  %v2661_v2 = vsel %vm906_vm5, %v2656_v1, %v2658_v61  ;;  %vm5302_vm5 = vcmask 752640  }
 0x781   : > { %4119 = vmatpush3.msk.msra.mxu1 %vm424_vm1, %v2660_v60  ;;  %4120 = vmatprep.mubr.msk.f32.mxu1 %vm4444_vm0, %v4443_v0 }
 0x782   : > { %4123 = vmatprep.subr.mxu1 %v4443_v0 }
 0x783   : > { %3985 = vmatmul.mubr.msk.f32.vlgmr.msra.gmra.mrb[2].mxu0 %vm421_vm3, %v2482_v57  ;;  %v2829_v3 = vpop.permute.xlu0 %2828  ;;  %v2827_v5 = vpop.permute.xlu1 %2826 }
 0x784   : > { %3989 = vmatpush1.msk.msra.mxu0 %vm424_vm1, %v2661_v2  ;;  %2735 = vmatprep.mubr.f32.mxu0 %v4443_v0  ;;  %v2831_v6 = vsel %vm5300_vm2, %v2827_v5, %v2829_v3 }
 0x785   : > { %3993 = vmatprep.subr.msk.mxu0 %vm424_vm1, %v2831_v6 }
 0x787   : > { %v2820_v8 = vpop.permute.xlu0 %2819  ;;  %v2825_v11 = vpop.permute.xlu1 %2824 }
 0x788   : > { %4121 = vmatmul.mubr.msk.f32.vlgmr.msra.gmra.mrb[2].mxu1 %vm421_vm3, %v2651_v63  ;;  %v2830_v12 = vsel %vm5301_vm4, %v2825_v11, %v2827_v5 }
 0x789   : > { %4124 = vmatpush3.msk.msra.mxu1 %vm424_vm1, %v2829_v3  ;;  %4125 = vmatprep.mubr.msk.f32.mxu1 %vm4444_vm0, %v4443_v0 }
 0x78a   : > { %4128 = vmatprep.subr.mxu1 %v4443_v0 }
 0x78b   : > { %3990 = vmatmul.mubr.msk.f32.vlgmr.msra.gmra.mrb[2].mxu0 %vm421_vm3, %v2651_v63  ;;  %v2998_v14 = vpop.permute.xlu0 %2997  ;;  %v2996_v15 = vpop.permute.xlu1 %2995 }
 0x78c   : > { %3994 = vmatpush1.msk.msra.mxu0 %vm424_vm1, %v2830_v12  ;;  %2904 = vmatprep.mubr.f32.mxu0 %v4443_v0  ;;  %v3000_v16 = vsel %vm1246_vm7, %v2996_v15, %v2998_v14 }
 0x78d   : > { %3998 = vmatprep.subr.msk.mxu0 %vm424_vm1, %v3000_v16 }
 0x78f   : > { %v2989_v18 = vpop.permute.xlu0 %2988  ;;  %v2994_v20 = vpop.permute.xlu1 %2993 }
 0x790   : > { %4126 = vmatmul.mubr.msk.f32.vlgmr.msra.gmra.mrb[2].mxu1 %vm421_vm3, %v2820_v8  ;;  %v2999_v21 = vsel %vm1246_vm7, %v2994_v20, %v2996_v15  ;;  %vm5303_vm7 = vmmov %vm5302_vm5 }
 0x791   : > { %4129 = vmatpush3.msk.msra.mxu1 %vm424_vm1, %v2998_v14  ;;  %4130 = vmatprep.mubr.msk.f32.mxu1 %vm4444_vm0, %v4443_v0 }
 0x792   : > { %4133 = vmatprep.subr.mxu1 %v4443_v0 }
 0x793   : > { %3995 = vmatmul.mubr.msk.f32.vlgmr.msra.gmra.mrb[2].mxu0 %vm421_vm3, %v2820_v8  ;;  %v3167_v22 = vpop.permute.xlu0 %3166  ;;  %v3165_v24 = vpop.permute.xlu1 %3164 }
 0x794   : > { %3999 = vmatpush1.msk.msra.mxu0 %vm424_vm1, %v2999_v21  ;;  %3073 = vmatprep.mubr.f32.mxu0 %v4443_v0  ;;  %v3169_v25 = vsel %vm5302_vm5, %v3165_v24, %v3167_v22 }
 0x795   : > { %4003 = vmatprep.subr.msk.mxu0 %vm424_vm1, %v3169_v25 }
 0x797   : > { %v3158_v26 = vpop.permute.xlu0 %3157  ;;  %v3163_v27 = vpop.permute.xlu1 %3162 }
 0x798   : > { %4131 = vmatmul.mubr.msk.f32.vlgmr.msra.gmra.mrb[2].mxu1 %vm421_vm3, %v2989_v18  ;;  %v3168_v28 = vsel %vm5303_vm7, %v3163_v27, %v3165_v24 }
 0x799   : > { %4134 = vmatpush3.msk.msra.mxu1 %vm424_vm1, %v3167_v22  ;;  %4135 = vmatprep.mubr.msk.f32.mxu1 %vm4444_vm0, %v4443_v0 }
 0x79a   : > { %4138 = vmatprep.subr.mxu1 %v4443_v0 }
 0x79b   : > { %4000 = vmatmul.mubr.msk.f32.vlgmr.msra.gmra.mrb[2].mxu0 %vm421_vm3, %v2989_v18  ;;  %v3336_v29 = vpop.permute.xlu0 %3335  ;;  %v3334_v31 = vpop.permute.xlu1 %3333 }
 0x79c   : > { %4004 = vmatpush1.msk.msra.mxu0 %vm424_vm1, %v3168_v28  ;;  %3242 = vmatprep.mubr.f32.mxu0 %v4443_v0  ;;  %v3338_v32 = vsel %vm5304_vm14, %v3334_v31, %v3336_v29 }
 0x79d   : > { %4008 = vmatprep.subr.msk.mxu0 %vm424_vm1, %v3338_v32 }
 0x79f   : > { %v3327_v33 = vpop.permute.xlu0 %3326  ;;  %v3332_v34 = vpop.permute.xlu1 %3331 }
 0x7a0   : > { %4136 = vmatmul.mubr.msk.f32.vlgmr.msra.gmra.mrb[2].mxu1 %vm421_vm3, %v3158_v26  ;;  %v3337_v36 = vsel %vm5305_vm15, %v3332_v34, %v3334_v31 }
 0x7a1   : > { %4139 = vmatpush3.msk.msra.mxu1 %vm424_vm1, %v3336_v29  ;;  %4140 = vmatprep.mubr.msk.f32.mxu1 %vm4444_vm0, %v4443_v0 }
 0x7a2   : > { %4143 = vmatprep.subr.mxu1 %v4443_v0 }
 0x7a3   : > { %4005 = vmatmul.mubr.msk.f32.vlgmr.msra.gmra.mrb[2].mxu0 %vm421_vm3, %v3158_v26  ;;  %v3505_v37 = vpop.permute.xlu0 %3504  ;;  %v3503_v38 = vpop.permute.xlu1 %3502 }
 0x7a4   : > { %4009 = vmatpush1.msk.msra.mxu0 %vm424_vm1, %v3337_v36  ;;  %3411 = vmatprep.mubr.f32.mxu0 %v4443_v0  ;;  %v3507_v39 = vsel %vm5306_vm13, %v3503_v38, %v3505_v37 }
 0x7a5   : > { %4013 = vmatprep.subr.msk.mxu0 %vm424_vm1, %v3507_v39 }
 0x7a7   : > { %v3501_v40 = vpop.permute.xlu1 %3500  ;;  %v3496_v42 = vpop.permute.xlu0 %3495 }
 0x7a8   : > { %4141 = vmatmul.mubr.msk.f32.vlgmr.msra.gmra.mrb[2].mxu1 %vm421_vm3, %v3327_v33  ;;  %v3506_v41 = vsel %vm5307_vm11, %v3501_v40, %v3503_v38 }
 0x7a9   : > { %4144 = vmatpush3.msk.msra.mxu1 %vm424_vm1, %v3505_v37  ;;  %4145 = vmatprep.mubr.msk.f32.mxu1 %vm4444_vm0, %v4443_v0  ;;  %vm5308_vm0 = vcmask 257024  }
 0x7aa   : > { %vm5313_vm8 = vmmov %vm5308_vm0 }
 0x7ab   : > { %4010 = vmatmul.mubr.msk.f32.vlgmr.msra.gmra.mrb[2].mxu0 %vm421_vm3, %v3327_v33 }
 0x7ac   : > { %4014 = vmatpush1.msk.msra.mxu0 %vm424_vm1, %v3506_v41  ;;  %3580 = vmatprep.mubr.f32.mxu0 %v4443_v0 }
 0x7b0   : > { %4146 = vmatmul.mubr.msk.f32.vlgmr.msra.gmra.mrb[2].mxu1 %vm421_vm3, %v3496_v42 }
 0x7b3   : > { %4015 = vmatmul.mubr.msk.f32.vlgmr.msra.gmra.mrb[2].mxu0 %vm421_vm3, %v3496_v42  ;;  %vm5309_vm3 = vmmov %vm5308_vm0 }
 0x883   : > { %v5124_v45 = vpop.f32.mrb[2].mxu1 }
 0x884   : > { %v4147_v35 = vpop.f32.mrb[3].mxu1  ;;  %v3682_v19 = vmul.f32 %v3676_v44, %v5124_v45 }
 0x886   : > { %v5129_v47 = vpop.f32.mrb[2].mxu0  ;;  %v3692_v49 = vmul.f32 %v3682_v19, %v3682_v19  ;;  %v3686_v52 = vsel %vm5308_vm0, %v3682_v19, 0.0 }
 0x887   : > { %v3680_v13 = vmul.f32 %v3668_v46, %v5129_v47  ;;  %v5132_v48 = vpop.f32.mrb[3].mxu0  ;;  %v3752_v46 = vstv %s402_s8  ;;  %s4375_s8 = scalar_lea.vmem %s4374_s16, 384 }
 0x888   : > { %v3681_v4 = vmul.f32 %v3672_v17, %v5132_v48  ;;  %v3696_v56 = vsel %vm5309_vm3, %v3692_v49, 0.0 }
 0x889   : > { %v3683_v0 = vsel %vm424_vm1, %v3680_v13, 0.0  ;;  %v3690_v7 = vmul.f32 %v3680_v13, %v3680_v13 }
 0x88a   : > { %v3684_v50 = vsel %vm424_vm1, %v3681_v4, 0.0  ;;  %v3691_v9 = vmul.f32 %v3681_v4, %v3681_v4 }
 0x88b   : > { %v3685_v51 = vadd.f32 %v3684_v50, %v3683_v0  ;;  %v3693_v10 = vsel %vm424_vm1, %v3690_v7, 0.0 }
 0x88c   : > { %v3694_v53 = vsel %vm424_vm1, %v3691_v9, 0.0  ;;  %vm5311_vm1 = vmmov %vm5310_vm10 }
 0x88d   : > { %v3687_v54 = vadd.f32 %v3686_v52, %v3685_v51  ;;  %v3695_v55 = vadd.f32 %v3694_v53, %v3693_v10  ;;  %vm5312_vm6 = vmmov %vm5311_vm1 }
 0x88f   : > { %3688 = vadd.xlane.f32.xlu1 %v3687_v54  ;;  %v3697_v57 = vadd.f32 %v3696_v56, %v3695_v55 }
 0x91c   : > { %v3689_v58 = vpop.xlane.xlu1 %3688 }
 0x91d   : > { %v3700_v60 = vmul.f32 0.00390625, %v3689_v58 }
 0x91f   : > { %v5147_v61 = vadd.f32 %v3700_v60, %v5144_v59  ;;  %v3701_v63 = vmul.f32 256.0, %v3700_v60 }
 0x921   : > { %v3709_v62 = vsel %vm5310_vm10, %v5147_v61, 0.0  ;;  %v3702_v5 = vmul.f32 %v3701_v63, %v3700_v60  ;;  %v3759_v17 = vmul.f32 %v3752_v46, %v5147_v61 }
 0x922   : > { %3710 = vadd.xlane.f32.xlu0 %v3709_v62 }
 0x926   : > { %3698 = vadd.xlane.f32.xlu0 %v3697_v57 }
 0x9af   : > { %v3711_v1 = vpop.xlane.xlu0 %3710 }
 0x9b0   : > { %v3712_v2 = vrot.slane %v3711_v1, 4 }
 0x9b2   : > { %v3713_v3 = vadd.f32 %v3712_v2, %v3711_v1 }
 0x9b3   : > { %v3699_v6 = vpop.xlane.xlu0 %3698 }
 0x9b4   : > { %v3714_v8 = vrot.slane %v3713_v3, 2  ;;  %v3703_v11 = vsub.f32 %v3699_v6, %v3702_v5 }
 0x9b6   : > { %v3704_v12 = vmax.f32 %v3703_v11, 0.0  ;;  %v3715_v14 = vadd.f32 %v3714_v8, %v3713_v3 }
 0x9b8   : > { %v3722_v15 = vsel %vm5311_vm1, %v3704_v12, 0.0  ;;  %v3716_v16 = vrot.slane %v3715_v14, 1  ;;  %v3706_v43 = vmul.f32 0.003921569, %v3704_v12 }
 0x9b9   : > { %3723 = vadd.xlane.f32.xlu1 %v3722_v15 }
 0x9ba   : > { %v3717_v18 = vadd.f32 %v3716_v16, %v3715_v14  ;;  %v3707_v44 = vadd.f32 1e-06, %v3706_v43 }
 0x9bc   : > { %4222 = vpush %v3717_v18 }
 0x9ed   : > { %s5152_s28 = spop %4222 }
 0x9ee   : > { %s3721_s14 = smul.f32 0.25, %s5152_s28 }
 0x9ef   : > { %s4230_s28 = smul.u32 192, %s4537_s13  ;;  %s3792_s13 = scalar_lea.sflag [#allocation5], %s376_s0 }
 0x9f0   : > { %v3732_v20 = vstv %s3721_s14  ;;  %s3761_s17 = smul.f32 %s3754_s24, %s3721_s14  ;;  %s378_s14 = scalar_lea.vmem [#allocation8], %s4212_s27 }
 0x9f1   : > { %v3733_v21 = vsub.f32 %v5147_v61, %v3732_v20 }
 0x9f3   : > { %v3734_v22 = vmul.f32 %v3733_v21, %v3733_v21 }
 0x9f5   : > { %v3735_v24 = vsel %vm5312_vm6, %v3734_v22, 0.0 }
 0x9f6   : > { %3736 = vadd.xlane.f32.xlu0 %v3735_v24 }
 0xa46   : > { %v3724_v25 = vpop.xlane.xlu1 %3723 }
 0xa47   : > { %v3725_v26 = vrot.slane %v3724_v25, 4 }
 0xa49   : > { %v3726_v27 = vadd.f32 %v3725_v26, %v3724_v25 }
 0xa4b   : > { %v3727_v28 = vrot.slane %v3726_v27, 2 }
 0xa4d   : > { %v3728_v29 = vadd.f32 %v3727_v28, %v3726_v27 }
 0xa4f   : > { %v3729_v31 = vrot.slane %v3728_v29, 1 }
 0xa51   : > { %v3730_v32 = vadd.f32 %v3729_v31, %v3728_v29 }
 0xa53   : > { %4224 = vpush %v3730_v32 }
 0xa83   : > { %v3737_v33 = vpop.xlane.xlu0 %3736 }
 0xa84   : > { %v3738_v34 = vrot.slane %v3737_v33, 4  ;;  %s4225_s2 = spop %4224 }
 0xa86   : > { %v3739_v36 = vadd.f32 %v3738_v34, %v3737_v33 }
 0xa88   : > { %v3740_v37 = vrot.slane %v3739_v36, 2 }
 0xa8a   : > { %v3741_v38 = vadd.f32 %v3740_v37, %v3739_v36 }
 0xa8c   : > { %v3742_v39 = vrot.slane %v3741_v38, 1 }
 0xa8e   : > { %v3743_v40 = vadd.f32 %v3742_v39, %v3741_v38 }
 0xa90   : > { %4226 = vpush %v3743_v40 }
 0xac1   : > { %s4227_s22 = spop %4226 }
 0xac2   : > { %s3745_s21 = smul.f32 256.0, %s4227_s22 }
 0xac4   : > { %s3746_s25 = sadd.f32 %s4225_s2, %s3745_s21  ;;  %s3806_s21 = sshll.u32 %s378_s14, 4  ;;  %s5179_s21 = int_to_ptr.vmem [resolvable:$true] %s3806_s21 }
 0xac5   : > { %s4369_s26 = scalar_lea.vmem %s5179_s21, 192  ;;  %p4376_p6 = scmp.lt.s32.totalorder %s5179_s21, %s4374_s16 }
 0xac6   : > { %s3747_s3 = smul.f32 0.0009775171, %s3746_s25  ;;  %p4370_p12 = scmp.ne.s32.totalorder %s5179_s21, %s4369_s26 }
 0xac7   : > { %p4377_p5 = scmp.lt.s32.totalorder %s4375_s8, %s4369_s26 }
 0xac8   : > { %s3748_s23 = sadd.f32 1e-06, %s3747_s3  ;;  %p4371_p1 = pnand %p4370_p12, %p5314_p13 }
 0xac9   : > { %p4378_p9 = por %p4377_p5, %p4376_p6 }
 0xaca   : > { %v3749_v41 = vstv %s3748_s23  ;;  %s5177_s23 = scalar_lea.hbm %s5228_s9, %s4230_s28  ;;  %p4372_p2 = pneg %p4371_p1 }
 0xacb   : > { %4322 = vrsqrt.f32 %v3749_v41 }
 0xacc   : > { %4324 = vrsqrt.f32 %v3707_v44  ;;  %p4379_p10 = pnand %p4378_p9, %p4372_p2 }
 0xad5   : > { %v4323_v42 = vpop.eup %4322 }
 0xad6   : > { %4228 = vpush %v4323_v42  ;;  %v4325_v35 = vpop.eup %4324 }
 0xad7   : > { %v3753_v19 = vmul.f32 %v4325_v35, %v3752_v46  ;;  %v3760_v4 = vmul.f32 %v4325_v35, %v3759_v17 }
 0xb07   : > { %s4229_s29 = spop %4228 }
 0xb08   : > { %s3755_s2 = smul.f32 %s4229_s29, %s3754_s24 }
 0xb09   : > { %s3762_s22 = smul.f32 %s4229_s29, %s3761_s17 }
 0xb0a   : > { %v3756_v13 = vstv %s3755_s2 }
 0xb0b   : > { %v3757_v0 = vadd.f32 %v3756_v13, %v3753_v19  ;;  %v3763_v7 = vstv %s3762_s22 }
 0xb0c   : > { %v3764_v49 = vadd.f32 %v3763_v7, %v3760_v4 }
 0xb0d   : > { %v3758_v50 = vmul.f32 %v3757_v0, %v4891_v23 }
 0xb0e   : > { %v3765_v9 = vmul.f32 %v3764_v49, %v4891_v23 }
 0xb0f   : > { %3771 = vperm.xlu1 %4314, %v3758_v50   ;;  %v3767_v51 = vmul.f32 %v3758_v50, %v5144_v59 }
 0xb10   : > { %v3766_v10 = vsub.f32 %v4897_v30, %v3765_v9 }
 0xb12   : > { %v3768_v52 = vadd.f32 %v3767_v51, %v3766_v10 }
 0xb14   : > { %3779 = vperm.xlu0 %4313, %v3768_v52  }
 0xb8e   : > { %v3772_v53 = vpop.permute.xlu1 %3771 }
 0xb8f   : > { %v3774_v54 = vmul.f32 %v3772_v53, %v5129_v47  ;;  %v3775_v55 = vmul.f32 %v3772_v53, %v5132_v48  ;;  %v3776_v56 = vmul.f32 %v3772_v53, %v5124_v45 }
 0xb93   : > { %v3780_v57 = vpop.permute.xlu0 %3779 }
 0xb94   : > { %v3782_v23 = vadd.f32 %v3780_v57, %v3774_v54  ;;  %v3783_v58 = vadd.f32 %v3780_v57, %v3775_v55  ;;  %v3784_v59 = vadd.f32 %v3780_v57, %v3776_v56 }
 0xb96   : > { %v3787_v30 = vcombine.low %v3782_v23, %v3783_v58  ;;  %3790 = vst.msk [vmem:[%s378_s14 + $0x8] sm:$0xf] %vm5313_vm8, %v3784_v59 }
 0xb98   : > { %3789 = vst [vmem:[%s378_s14] sm:$0xff] %v3787_v30 }
 0xb99   : > { %4382 = shalt.err (!%p4379_p10)
}
 0xb9a   : > { %s4383_s24 = scalar_lea.hbm %s5177_s23, 192  ;;  %s4387_s2 = scalar_lea.hbm %s5228_s9, 384 }
 0xb9b   : > { %p4384_p3 = scmp.ne.s32.totalorder %s5177_s23, %s4383_s24  ;;  %p4388_p7 = scmp.lt.u32.totalorder %s5177_s23, %s5228_s9 }
 0xb9c   : > { %p4389_p8 = scmp.lt.u32.totalorder %s4387_s2, %s4383_s24  ;;  %p4391_p12 = scmp.lt.u32.totalorder %s4383_s24, %s5177_s23 }
 0xb9d   : > { %p4385_p4 = pnand %p4384_p3, %p5314_p13 }
 0xb9e   : > { %p4390_p11 = por %p4389_p8, %p4388_p7 }
 0xb9f   : > { %p4386_p0 = pneg %p4385_p4 }
 0xba0   : > { %p4392_p1 = por %p4391_p12, %p4390_p11 }
 0xba2   : > { %p4393_p2 = pnand %p4392_p1, %p4386_p0 }
 0xba4   : > { %4396 = shalt.err (!%p4393_p2)
}
 0xba5   : > { %4239 = dma.vmem_to_hbm [thread:$0]  (%p5314_p13), %s5179_s21, 192, %s5177_s23, %s3792_s13  }
 0xba6 PF: > { %p4256_p6 = scmp.ge.s32.totalorder %s4439_s12, 2  ;;  %s3818_s27 = sand.u32 1, %s4427_s30  }
 0xba7   : > { %p5315_p5 = scmp.ne.s32.totalorder %s5269_s20, 0  ;;  %s3819_s28 = scalar_lea.sflag [#allocation5], %s3818_s27 }
 0xba9   : > { %p4249_p9 = pnand %p4256_p6, %p5315_p5 }
 0xbab   : > { %4422 = dma.done.wait (!%p4249_p9), %s3819_s28, 192  }
 0xbac   : > { %4424 = vsyncadd (!%p4249_p9), %s3819_s28, 4294967104  ;;  %p21_p10 = scmp.ge.s32.totalorder %s4541_s15, 4   ;;  %s5316_s30 = smov %s4431_s10 }
 0xbad   : > { %s5317_s10 = smov %s4435_s11  ;;  %s5318_s11 = smov %s4552_s18 }
 0xbae   : > { %s5319_s12 = smov %s4541_s15  ;;  %23 = sbr.rel (!%p21_p10) target bundleno = 11 (0xb), region = 107 }
 0xbb5   :  { %3824 = vsyncpa [#allocation4], 1 }
 0xbb6   :  { %3826 = vsyncpa [#allocation4 + $0x1], 1 }
 0xbb7   :  { %3827 = vsyncpa [#allocation5], 1 }
 0xbb8   :  { %3829 = vsyncpa [#allocation5 + $0x1], 1 }
 0xbb9   :  { %3830 = vsyncpa [#allocation6], 1 }
 0xbba   :  { %3832 = vsyncpa [#allocation6 + $0x1], 1 }

</bundles_post_ra>
